<compile_context>
chip_gen: v6e
topology: v6e:2x2x1
jax: 0.10.0
libtpu: 0.0.40
codegen_flags: <defaults>
</compile_context>

<pallas_src>
import jax
import jax.numpy as jnp
from jax.experimental import pallas as pl
from jax.experimental.pallas import tpu as pltpu


def _leaky_relu(x, slope=0.01):        # nn.LeakyReLU() default slope
    return jnp.where(x > 0, x, slope * x)


# ---------------------------------------------------------------------------
# Pallas kernel: fused per-node MLPs for both heads-fused networks.
#   out[:, :heads*out]                   = MH_M messages (head-major layout)
#   out[:, heads*out : heads*out+heads]  = MH_A per-head attention logits
#   out[:, heads*out+heads : w_pad]      = zero padding (lane-dense stores)
# ---------------------------------------------------------------------------
def _mha_fused_kernel(x_ref, w1_ref, b1_ref, w2_ref, b2_ref, out_ref):
    # layer 1: one wide dot, K = 2*in, accumulate in f32
    h = jnp.dot(x_ref[...], w1_ref[...], preferred_element_type=jnp.float32)
    h = _leaky_relu(h + b1_ref[...])
    # layer 2: block-diagonal per-head weights, f32 accumulation
    o = jnp.dot(h.astype(w2_ref.dtype), w2_ref[...],
                preferred_element_type=jnp.float32)
    out_ref[...] = (o + b2_ref[...]).astype(out_ref.dtype)


def _pack_params(params, heads, in_channels, hidden, out_channels, w_pad,
                 compute_dtype):
    """Pack per-head weights into heads-fused / block-diagonal, lane-padded slabs."""
    HH = heads * hidden
    f32 = jnp.float32
    w_out = heads * out_channels + heads

    # fused first layer over x = [fea | cry_fea[index]]  (2*in, 2*HH):
    #   columns [0:HH)   -> message hidden  (only the fea rows are nonzero)
    #   columns [HH:2HH) -> attention hidden (uses the full 2*in input)
    wm1 = jnp.transpose(params['wm1'], (1, 0, 2)).reshape(in_channels, HH)
    wa1 = jnp.transpose(params['wa1'], (1, 0, 2)).reshape(2 * in_channels, HH)
    w1 = jnp.concatenate(
        [jnp.concatenate([wm1, jnp.zeros((in_channels, HH), wm1.dtype)], axis=0),
         wa1], axis=1).astype(compute_dtype)                         # (2*in, 2*HH)
    b1 = jnp.concatenate([params['bm1'].reshape(1, HH),
                          params['ba1'].reshape(1, HH)], axis=1).astype(f32)

    # block-diagonal second layer, zero-padded to lane-dense width w_pad
    wm2_bd = jax.scipy.linalg.block_diag(*[params['wm2'][h] for h in range(heads)])
    wa2_bd = jax.scipy.linalg.block_diag(*[params['wa2'][h] for h in range(heads)])
    w2 = jnp.zeros((2 * HH, w_pad), f32)
    w2 = w2.at[:HH, :heads * out_channels].set(wm2_bd)
    w2 = w2.at[HH:, heads * out_channels:w_out].set(wa2_bd)
    w2 = w2.astype(compute_dtype)                                    # (2*HH, w_pad)

    b2 = jnp.zeros((1, w_pad), f32)
    b2 = b2.at[:, :heads * out_channels].set(params['bm2'].reshape(1, -1))
    b2 = b2.at[:, heads * out_channels:w_out].set(params['ba2'].reshape(1, -1))
    return w1, b1, w2, b2


def mh_attention(params, fea, cry_fea, index, size, *, heads, out_channels,
                 tile_n=512, compute_dtype=jnp.float32):
    """Forward pass of MHAttention. Returns (size, heads*out_channels) float32."""
    N, in_channels = fea.shape
    hidden = params['wm1'].shape[-1]
    w_out = heads * out_channels + heads
    w_pad = ((w_out + 127) // 128) * 128          # lane-dense output width

    w1, b1, w2, b2 = _pack_params(params, heads, in_channels, hidden,
                                  out_channels, w_pad, compute_dtype)

    # x = [fea, cry_fea[index]]  — gather + concat (+ optional bf16 cast) is one
    # fused XLA pass; the kernel then does a single K = 2*in dot per tile.
    x = jnp.concatenate([fea, jnp.take(cry_fea, index, axis=0)], axis=-1)
    x = x.astype(compute_dtype)                                      # (N, 2*in)

    grid = (pl.cdiv(N, tile_n),)                  # ragged last block; no jnp.pad

    def const_spec(a):
        # constant block index => DMA'd once, not re-fetched between grid steps
        return pl.BlockSpec(a.shape, lambda i: (0, 0))

    fused = pl.pallas_call(
        _mha_fused_kernel,
        out_shape=jax.ShapeDtypeStruct((N, w_pad), jnp.float32),
        grid_spec=pltpu.PrefetchScalarGridSpec(
            num_scalar_prefetch=0,
            grid=grid,
            in_specs=[
                pl.BlockSpec((tile_n, 2 * in_channels), lambda i: (i, 0)),  # node tile
                const_spec(w1), const_spec(b1), const_spec(w2), const_spec(b2),
            ],
            out_specs=pl.BlockSpec((tile_n, w_pad), lambda i: (i, 0)),
        ),
        compiler_params=pltpu.CompilerParams(
            dimension_semantics=("parallel",)),
    )(x, w1, b1, w2, b2)

    msg = fused[:, :heads * out_channels]                  # (N, heads*out)
    logits = fused[:, heads * out_channels:w_out]          # (N, heads)

    # segment softmax over nodes grouped by `index` (torch_geometric.utils.softmax)
    seg_max = jax.ops.segment_max(logits, index, num_segments=size)
    e = jnp.exp(logits - seg_max[index])
    den = jax.ops.segment_sum(e, index, num_segments=size)
    alpha = e / (den[index] + 1e-16)                       # (N, heads)

    # scatter_add((alpha * m).view(-1, heads*out), index)
    weighted = (alpha[:, :, None] * msg.reshape(N, heads, out_channels)
                ).reshape(N, heads * out_channels)
    return jax.ops.segment_sum(weighted, index, num_segments=size)


# ---------------------------------------------------------------------------
# Plain-JAX reference mirroring the PyTorch forward (per-head, unfused).
# ---------------------------------------------------------------------------
def _reference(params, fea, cry_fea, index, size, *, heads, out_channels):
    cat = jnp.concatenate([fea, cry_fea[index]], axis=-1)            # (N, 2*in)

    def mh(x, w1, b1, w2, b2):
        h = _leaky_relu(jnp.einsum('nf,hfk->nhk', x, w1) + b1[None])
        return jnp.einsum('nhk,hko->nho', h, w2) + b2[None]

    m = mh(fea, params['wm1'], params['bm1'], params['wm2'], params['bm2'])          # (N,h,out)
    a = mh(cat, params['wa1'], params['ba1'], params['wa2'], params['ba2'])[..., 0]  # (N,h)

    seg_max = jax.ops.segment_max(a, index, num_segments=size)
    e = jnp.exp(a - seg_max[index])
    den = jax.ops.segment_sum(e, index, num_segments=size)
    alpha = e / (den[index] + 1e-16)

    weighted = (alpha[:, :, None] * m).reshape(-1, heads * out_channels)
    return jax.ops.segment_sum(weighted, index, num_segments=size)


if __name__ == "__main__":
    key = jax.random.PRNGKey(0)
    in_channels, out_channels, heads = 16, 8, 4
    hidden = in_channels              # MHAttention uses hidden_layer_dim = in_channels
    S = 8                             # crystals (graphs)
    nodes_per_crystal = 75
    N = S * nodes_per_crystal         # 600 nodes -> grid of 2 ragged tiles at tile_n=512

    keys = jax.random.split(key, 10)

    def init(k, shape, scale=0.1):
        return (scale * jax.random.normal(k, shape)).astype(jnp.float32)

    params = dict(
        # MH_A: input 2*in -> hidden -> 1 per head
        wa1=init(keys[0], (heads, 2 * in_channels, hidden)),
        ba1=init(keys[1], (heads, hidden)),
        wa2=init(keys[2], (heads, hidden, 1)),
        ba2=init(keys[3], (heads, 1)),
        # MH_M: input in -> hidden -> out per head
        wm1=init(keys[4], (heads, in_channels, hidden)),
        bm1=init(keys[5], (heads, hidden)),
        wm2=init(keys[6], (heads, hidden, out_channels)),
        bm2=init(keys[7], (heads, out_channels)),
    )

    fea = init(keys[8], (N, in_channels), 1.0)
    cry_fea = init(keys[9], (S, in_channels), 1.0)
    # sorted batch index (PyG-style batching)
    index = jnp.repeat(jnp.arange(S, dtype=jnp.int32), nodes_per_crystal)

    out_ref = _reference(params, fea, cry_fea, index, S,
                         heads=heads, out_channels=out_channels)

    # f32 compute path (exact vs reference)
    out = mh_attention(params, fea, cry_fea, index, S,
                       heads=heads, out_channels=out_channels)
    jax.block_until_ready(out)
    assert out.shape == (S, heads * out_channels)
    assert jnp.allclose(out, out_ref, atol=1e-3, rtol=1e-3)

    # bf16 compute path (halves HBM traffic / 2x MXU rate on v6e/v7x), f32 accumulation
    out_bf16 = mh_attention(params, fea, cry_fea, index, S,
                            heads=heads, out_channels=out_channels,
                            compute_dtype=jnp.bfloat16)
    jax.block_until_ready(out_bf16)
    assert jnp.allclose(out_bf16, out_ref, atol=5e-2, rtol=5e-2)

    print("KERNEL_OK")
</pallas_src>

<mosaic_0001>
module attributes {stable_mosaic.version = 11 : i64} {
  func.func @_mha_fused_kernel(%arg0: i32, %arg1: memref<512x32xf32, #tpu.memory_space<vmem>>, %arg2: memref<32x128xf32, #tpu.memory_space<vmem>>, %arg3: memref<1x128xf32, #tpu.memory_space<vmem>>, %arg4: memref<128x128xf32, #tpu.memory_space<vmem>>, %arg5: memref<1x128xf32, #tpu.memory_space<vmem>>, %arg6: memref<512x128xf32, #tpu.memory_space<vmem>>) attributes {dimension_semantics = [#tpu.dimension_semantics<parallel>], iteration_bounds = array<i64: 2>, scalar_prefetch = 0 : i64, scratch_operands = 0 : i64, tpu.core_type = #tpu.core_type<tc>, window_params = [{transform_indices = @transform_0, window_bounds = array<i64: 512, 32>}, {pipeline_mode = #tpu.pipeline_mode<synchronous>, transform_indices = @transform_1, window_bounds = array<i64: 32, 128>}, {pipeline_mode = #tpu.pipeline_mode<synchronous>, transform_indices = @transform_2, window_bounds = array<i64: 1, 128>}, {pipeline_mode = #tpu.pipeline_mode<synchronous>, transform_indices = @transform_3, window_bounds = array<i64: 128, 128>}, {pipeline_mode = #tpu.pipeline_mode<synchronous>, transform_indices = @transform_4, window_bounds = array<i64: 1, 128>}, {transform_indices = @transform_5, window_bounds = array<i64: 512, 128>}]} {
    %c0 = arith.constant 0 : index
    %c0_0 = arith.constant 0 : index
    %0 = vector.load %arg1[%c0, %c0_0] : memref<512x32xf32, #tpu.memory_space<vmem>>, vector<512x32xf32>
    %c0_1 = arith.constant 0 : index
    %c0_2 = arith.constant 0 : index
    %1 = vector.load %arg2[%c0_1, %c0_2] : memref<32x128xf32, #tpu.memory_space<vmem>>, vector<32x128xf32>
    %cst = arith.constant dense<0.000000e+00> : vector<512x128xf32>
    %2 = tpu.matmul %0, %1, %cst {dimension_numbers = #tpu.dot_dimension_numbers<[1], [0], [0], [1], [0, 0, 1, 1], [], []>} : vector<512x32xf32>, vector<32x128xf32>, vector<512x128xf32> -> vector<512x128xf32>
    %c0_3 = arith.constant 0 : index
    %c0_4 = arith.constant 0 : index
    %3 = vector.load %arg3[%c0_3, %c0_4] : memref<1x128xf32, #tpu.memory_space<vmem>>, vector<1x128xf32>
    %4 = vector.broadcast %3 : vector<1x128xf32> to vector<512x128xf32>
    %5 = arith.addf %2, %4 : vector<512x128xf32>
    %cst_5 = arith.constant 0.000000e+00 : f32
    %6 = vector.broadcast %cst_5 : f32 to vector<512x128xf32>
    %7 = arith.cmpf ogt, %5, %6 : vector<512x128xf32>
    %cst_6 = arith.constant 0.00999999977 : f32
    %8 = vector.broadcast %cst_6 : f32 to vector<512x128xf32>
    %9 = arith.mulf %8, %5 : vector<512x128xf32>
    %10 = arith.select %7, %5, %9 : vector<512x128xi1>, vector<512x128xf32>
    %c0_7 = arith.constant 0 : index
    %c0_8 = arith.constant 0 : index
    %11 = vector.load %arg4[%c0_7, %c0_8] : memref<128x128xf32, #tpu.memory_space<vmem>>, vector<128x128xf32>
    %cst_9 = arith.constant dense<0.000000e+00> : vector<512x128xf32>
    %12 = tpu.matmul %10, %11, %cst_9 {dimension_numbers = #tpu.dot_dimension_numbers<[1], [0], [0], [1], [0, 0, 1, 1], [], []>} : vector<512x128xf32>, vector<128x128xf32>, vector<512x128xf32> -> vector<512x128xf32>
    %c0_10 = arith.constant 0 : index
    %c0_11 = arith.constant 0 : index
    %13 = vector.load %arg5[%c0_10, %c0_11] : memref<1x128xf32, #tpu.memory_space<vmem>>, vector<1x128xf32>
    %14 = vector.broadcast %13 : vector<1x128xf32> to vector<512x128xf32>
    %15 = arith.addf %12, %14 : vector<512x128xf32>
    %c0_12 = arith.constant 0 : index
    %c0_13 = arith.constant 0 : index
    %16 = vector.load %arg6[%c0_12, %c0_13] : memref<512x128xf32, #tpu.memory_space<vmem>>, vector<512x128xf32>
    tpu.vector_store %arg6[%c0_12, %c0_13], %15 {strides = array<i32>} : memref<512x128xf32, #tpu.memory_space<vmem>>, vector<512x128xf32>,
    return
  }
  func.func @transform_0(%arg0: i32) -> (i32, i32) {
    %c0_i32 = arith.constant 0 : i32
    %c0_i32_0 = arith.constant 0 : i32
    return %arg0, %c0_i32 : i32, i32
  }
  func.func @transform_1(%arg0: i32) -> (i32, i32) {
    %c0_i32 = arith.constant 0 : i32
    %c0_i32_0 = arith.constant 0 : i32
    %c0_i32_1 = arith.constant 0 : i32
    return %c0_i32, %c0_i32_0 : i32, i32
  }
  func.func @transform_2(%arg0: i32) -> (i32, i32) {
    %c0_i32 = arith.constant 0 : i32
    %c0_i32_0 = arith.constant 0 : i32
    %c0_i32_1 = arith.constant 0 : i32
    return %c0_i32, %c0_i32_0 : i32, i32
  }
  func.func @transform_3(%arg0: i32) -> (i32, i32) {
    %c0_i32 = arith.constant 0 : i32
    %c0_i32_0 = arith.constant 0 : i32
    %c0_i32_1 = arith.constant 0 : i32
    return %c0_i32, %c0_i32_0 : i32, i32
  }
  func.func @transform_4(%arg0: i32) -> (i32, i32) {
    %c0_i32 = arith.constant 0 : i32
    %c0_i32_0 = arith.constant 0 : i32
    %c0_i32_1 = arith.constant 0 : i32
    return %c0_i32, %c0_i32_0 : i32, i32
  }
  func.func @transform_5(%arg0: i32) -> (i32, i32) {
    %c0_i32 = arith.constant 0 : i32
    %c0_i32_0 = arith.constant 0 : i32
    return %arg0, %c0_i32 : i32, i32
  }
}

</mosaic_0001>

<bundles_post_ra>
// kernel: tpu_custom_call.1
= control target key start
LH: loop header
LB: loop body
LE: loop exit
PB: predicated region body
PF: predicated region fallthrough
CT: control target
= control target key end

     0   :  { %10 = vsyncpa [#allocation3], 0  ;;  %s2794_s0 = inlined_call_operand.vmem [shape: f32[600,32], index: 0, kind: input, shape index: {}]   ;;  %s2795_s1 = inlined_call_operand.vmem [shape: f32[32,128], index: 1, kind: input, shape index: {}]   ;;  %s2796_s2 = inlined_call_operand.vmem [shape: f32[1,128], index: 2, kind: input, shape index: {}]   ;;  %s2797_s3 = inlined_call_operand.vmem [shape: f32[128,128], index: 3, kind: input, shape index: {}]   ;;  %s2798_s4 = inlined_call_operand.vmem [shape: f32[1,128], index: 4, kind: input, shape index: {}]   ;;  %s2799_s5 = inlined_call_operand.hbm [shape: f32[600,128], index: 5, kind: output, shape index: {}]  }
   0x1   :  { %12 = vsyncpa [#allocation3 + $0x1], 0  ;;  %s2279_s18 = smov 0   ;;  %s2281_s19 = smov 0  }
   0x2   :  { %s2283_s20 = smov 0   ;;  %s2285_s21 = smov 0  }
   0x3 LB: > { %s2300_s22 = sadd.s32 4294967295, %s2244_s21   ;;  %s1649_s23 = sadd.s32 4294967294, %s2244_s21   ;;  %s2244_s21 = sphi %s2285_s21, %s2805_s21   ;;  %s2240_s20 = sphi %s2283_s20, %s2804_s20   ;;  %s2236_s19 = sphi %s2281_s19, %s2803_s19   ;;  %s2232_s18 = sphi %s2279_s18, %s2802_s18  }
   0x4   : > { %s2304_s24 = sadd.s32 1, %s2244_s21   ;;  %s135_s25 = sadd.s32 1, %s2240_s20 }
   0x5   : > { %s132_s26 = ssub.s32 %s2244_s21, %s2304_s24  ;;  %p145_p0 = scmp.ne.s32.totalorder %s2240_s20, %s2236_s19 }
   0x6   : > { %p133_p1 = scmp.eq.s32.totalorder %s132_s26, 0  ;;  %p146_p2 = scmp.eq.s32.totalorder %s2300_s22, 1 }
   0x7   : > { %p151_p3 = scmp.ne.s32.totalorder %s2236_s19, %s2232_s18  ;;  %p152_p4 = scmp.eq.s32.totalorder %s1649_s23, 1 }
   0x8   : > { %s2315_s27 = scalar_select %p133_p1, %s2240_s20, %s135_s25  }
   0x9   : > { %p2317_p5 = por %p146_p2, %p145_p0  ;;  %p2321_p6 = por %p152_p4, %p151_p3 }
   0xa   : > { %p1652_p7 = scmp.ge.s32.totalorder %s2244_s21, 1  ;;  %p199_p8 = scmp.lt.s32.totalorder %s2244_s21, 3 }
   0xc   : > { %p200_p9 = pnand %p1652_p7, %p199_p8 }
   0xd   : > { %s2334_s9 = sshll.u32 (!%p200_p9), %s2300_s22, 6 }
   0xe   : > { %203 = sbr.rel (%p200_p9) target bundleno = 578 (0x242), region = 40  ;;  %p236_p10 = scmp.lt.s32.totalorder (!%p200_p9), %s2334_s9, 74 }
  0x13   : > { %v317_v0 = vld [vmem:[%s2795_s1 + $0x18] sm:$0xff]  ;;  %v316_v1 = vld [vmem:[%s2795_s1 + $0x10] sm:$0xff]  ;;  %v315_v2 = vld [vmem:[%s2795_s1 + $0x8] sm:$0xff]  ;;  %s237_s12 = scalar_select %p236_p10, %s2334_s9, 74  ;;  %vm325_vm0 = vcmask 261120  }
  0x14   : > { %1880 = vmatprep.subr.mxu0 %v317_v0  ;;  %v314_v3 = vld [vmem:[%s2795_s1] sm:$0xff]  ;;  %v1110_v4 = vld [vmem:[%s2797_s3 + $0x78] sm:$0xff]  ;;  %v1109_v8 = vld [vmem:[%s2797_s3 + $0x70] sm:$0xff] }
  0x15   : > { %1881 = vmatpush3.msra.mxu0 %v317_v0  ;;  %s1655_s15 = sshll.u32 %s237_s12, 3  ;;  %2112 = vmatprep.subr.mxu1 %v1110_v4  ;;  %v1108_v10 = vld [vmem:[%s2797_s3 + $0x68] sm:$0xff]  ;;  %v1107_v12 = vld [vmem:[%s2797_s3 + $0x60] sm:$0xff]  ;;  %v1106_v14 = vld [vmem:[%s2797_s3 + $0x58] sm:$0xff] }
  0x16   : > { %1882 = vmatprep.subr.mxu0 %v316_v1  ;;  %s2350_s26 = scalar_lea.vmem %s2794_s0, %s1655_s15  ;;  %2128 = vmatpush3.msra.mxu1 %v1110_v4  ;;  %v1105_v16 = vld [vmem:[%s2797_s3 + $0x50] sm:$0xff]  ;;  %v1104_v23 = vld [vmem:[%s2797_s3 + $0x48] sm:$0xff]  ;;  %v1103_v24 = vld [vmem:[%s2797_s3 + $0x40] sm:$0xff]  ;;  %s1576_s15 = ssub.s32 (%p2317_p5), 75, %s2334_s9 }
  0x17   : > { %1883 = vmatpush3.msra.mxu0 %v316_v1  ;;  %v250_v5 = vld [vmem:[%s2350_s26] sm:$0xff]  ;;  %v251_v6 = vld [vmem:[%s2350_s26 + $0x8] sm:$0xff]  ;;  %v252_v7 = vld [vmem:[%s2350_s26 + $0x10] sm:$0xff]  ;;  %2113 = vmatprep.subr.mxu1 %v1109_v8  ;;  %p1577_p11 = scmp.lt.s32.totalorder (%p2317_p5), %s1576_s15, 64 }
  0x18   : > { %1884 = vmatprep.subr.mxu0 %v315_v2  ;;  %1888 = vmatprep.mubr.msk.f32.mxu0 %vm325_vm0, %v250_v5  ;;  %v253_v9 = vld [vmem:[%s2350_s26 + $0x18] sm:$0xff]  ;;  %v254_v11 = vld [vmem:[%s2350_s26 + $0x20] sm:$0xff]  ;;  %v255_v13 = vld [vmem:[%s2350_s26 + $0x28] sm:$0xff] }
  0x19   : > { %1885 = vmatpush3.msra.mxu0 %v315_v2  ;;  %2129 = vmatpush3.msra.mxu1 %v1109_v8  ;;  %v256_v15 = vld [vmem:[%s2350_s26 + $0x30] sm:$0xff]  ;;  %v257_v17 = vld [vmem:[%s2350_s26 + $0x38] sm:$0xff]  ;;  %v258_v18 = vld [vmem:[%s2350_s26 + $0x40] sm:$0xff] }
  0x1a   : > { %1886 = vmatprep.subr.mxu0 %v314_v3  ;;  %2114 = vmatprep.subr.mxu1 %v1108_v10  ;;  %v259_v19 = vld [vmem:[%s2350_s26 + $0x48] sm:$0xff]  ;;  %v260_v20 = vld [vmem:[%s2350_s26 + $0x50] sm:$0xff]  ;;  %v261_v21 = vld [vmem:[%s2350_s26 + $0x58] sm:$0xff] }
  0x1b   : > { %1887 = vmatpush3.msra.mxu0 %v314_v3  ;;  %2130 = vmatpush3.msra.mxu1 %v1108_v10  ;;  %v262_v22 = vld [vmem:[%s2350_s26 + $0x60] sm:$0xff]  ;;  %v263_v25 = vld [vmem:[%s2350_s26 + $0x68] sm:$0xff]  ;;  %v1102_v26 = vld [vmem:[%s2797_s3 + $0x38] sm:$0xff] }
  0x1c   : > { %1889 = vmatmul.mubr.msk.f32.vlgmr.msra.gmra.mxu0 %vm325_vm0, %v251_v6  ;;  %1984 = vmatprep.subr.mxu0 %v1110_v4  ;;  %v264_v27 = vld [vmem:[%s2350_s26 + $0x70] sm:$0xff]  ;;  %v265_v29 = vld [vmem:[%s2350_s26 + $0x78] sm:$0xff]  ;;  %v1100_v30 = vld [vmem:[%s2797_s3 + $0x28] sm:$0xff] }
  0x1d   : > { %1891 = vmatprep.mubr.msk.f32.mxu0 %vm325_vm0, %v252_v7  ;;  %1985 = vmatpush3.msra.mxu0 %v1110_v4  ;;  %v1101_v28 = vld [vmem:[%s2797_s3 + $0x30] sm:$0xff]  ;;  %v266_v31 = vld [vmem:[%s2350_s26 + $0x80] sm:$0xff]  ;;  %v267_v33 = vld [vmem:[%s2350_s26 + $0x88] sm:$0xff] }
  0x1e   : > { %1986 = vmatprep.subr.mxu0 %v1109_v8  ;;  %2115 = vmatprep.subr.mxu1 %v1107_v12  ;;  %v1099_v32 = vld [vmem:[%s2797_s3 + $0x20] sm:$0xff]  ;;  %v268_v34 = vld [vmem:[%s2350_s26 + $0x90] sm:$0xff]  ;;  %v269_v35 = vld [vmem:[%s2350_s26 + $0x98] sm:$0xff] }
  0x1f   : > { %1987 = vmatpush3.msra.mxu0 %v1109_v8  ;;  %2131 = vmatpush3.msra.mxu1 %v1107_v12  ;;  %v270_v36 = vld [vmem:[%s2350_s26 + $0xa0] sm:$0xff]  ;;  %v271_v37 = vld [vmem:[%s2350_s26 + $0xa8] sm:$0xff]  ;;  %v272_v38 = vld [vmem:[%s2350_s26 + $0xb0] sm:$0xff] }
  0x20   : > { %1892 = vmatmul.mubr.msk.f32.gmra.mxu0 %vm325_vm0, %v253_v9  ;;  %1988 = vmatprep.subr.mxu0 %v1108_v10  ;;  %v273_v39 = vld [vmem:[%s2350_s26 + $0xb8] sm:$0xff]  ;;  %v274_v40 = vld [vmem:[%s2350_s26 + $0xc0] sm:$0xff]  ;;  %v275_v41 = vld [vmem:[%s2350_s26 + $0xc8] sm:$0xff] }
  0x21   : > { %1894 = vmatprep.mubr.msk.f32.mxu0 %vm325_vm0, %v254_v11  ;;  %1989 = vmatpush3.msra.mxu0 %v1108_v10  ;;  %v276_v42 = vld [vmem:[%s2350_s26 + $0xd0] sm:$0xff]  ;;  %v277_v43 = vld [vmem:[%s2350_s26 + $0xd8] sm:$0xff]  ;;  %v278_v44 = vld [vmem:[%s2350_s26 + $0xe0] sm:$0xff] }
  0x22   : > { %1990 = vmatprep.subr.mxu0 %v1107_v12  ;;  %2116 = vmatprep.subr.mxu1 %v1106_v14  ;;  %v279_v45 = vld [vmem:[%s2350_s26 + $0xe8] sm:$0xff]  ;;  %v280_v46 = vld [vmem:[%s2350_s26 + $0xf0] sm:$0xff]  ;;  %v281_v47 = vld [vmem:[%s2350_s26 + $0xf8] sm:$0xff] }
  0x23   : > { %1991 = vmatpush3.msra.mxu0 %v1107_v12  ;;  %2132 = vmatpush3.msra.mxu1 %v1106_v14  ;;  %v282_v48 = vld [vmem:[%s2350_s26 + $0x100] sm:$0xff]  ;;  %v283_v49 = vld [vmem:[%s2350_s26 + $0x108] sm:$0xff]  ;;  %v284_v50 = vld [vmem:[%s2350_s26 + $0x110] sm:$0xff] }
  0x24   : > { %1895 = vmatmul.mubr.msk.f32.gmra.mxu0 %vm325_vm0, %v255_v13  ;;  %1992 = vmatprep.subr.mxu0 %v1106_v14  ;;  %v1098_v51 = vld [vmem:[%s2797_s3 + $0x18] sm:$0xff]  ;;  %v286_v53 = vld [vmem:[%s2350_s26 + $0x120] sm:$0xff]  ;;  %v1097_v54 = vld [vmem:[%s2797_s3 + $0x10] sm:$0xff] }
  0x25   : > { %1897 = vmatprep.mubr.msk.f32.mxu0 %vm325_vm0, %v256_v15  ;;  %1993 = vmatpush3.msra.mxu0 %v1106_v14  ;;  %v285_v52 = vld [vmem:[%s2350_s26 + $0x118] sm:$0xff]  ;;  %v1096_v55 = vld [vmem:[%s2797_s3 + $0x8] sm:$0xff]  ;;  %v288_v57 = vld [vmem:[%s2350_s26 + $0x130] sm:$0xff] }
  0x26   : > { %1994 = vmatprep.subr.mxu0 %v1105_v16  ;;  %2117 = vmatprep.subr.mxu1 %v1105_v16  ;;  %v287_v56 = vld [vmem:[%s2350_s26 + $0x128] sm:$0xff]  ;;  %v1095_v58 = vld [vmem:[%s2797_s3] sm:$0xff]  ;;  %v289_v59 = vld [vmem:[%s2350_s26 + $0x138] sm:$0xff] }
  0x27   : > { %1995 = vmatpush3.msra.mxu0 %v1105_v16  ;;  %2133 = vmatpush3.msra.mxu1 %v1105_v16  ;;  %v290_v60 = vld [vmem:[%s2350_s26 + $0x140] sm:$0xff]  ;;  %v291_v61 = vld [vmem:[%s2350_s26 + $0x148] sm:$0xff]  ;;  %v292_v62 = vld [vmem:[%s2350_s26 + $0x150] sm:$0xff] }
  0x28   : > { %1898 = vmatmul.mubr.msk.f32.gmra.mxu0 %vm325_vm0, %v257_v17  ;;  %1996 = vmatprep.subr.mxu0 %v1104_v23  ;;  %v293_v63 = vld [vmem:[%s2350_s26 + $0x158] sm:$0xff]  ;;  %v294_v0 = vld [vmem:[%s2350_s26 + $0x160] sm:$0xff]  ;;  %v295_v1 = vld [vmem:[%s2350_s26 + $0x168] sm:$0xff] }
  0x29   : > { %1900 = vmatprep.mubr.msk.f32.mxu0 %vm325_vm0, %v258_v18  ;;  %1997 = vmatpush3.msra.mxu0 %v1104_v23  ;;  %v296_v2 = vld [vmem:[%s2350_s26 + $0x170] sm:$0xff]  ;;  %v297_v3 = vld [vmem:[%s2350_s26 + $0x178] sm:$0xff]  ;;  %v298_v4 = vld [vmem:[%s2350_s26 + $0x180] sm:$0xff] }
  0x2a   : > { %1998 = vmatprep.subr.mxu0 %v1103_v24  ;;  %2118 = vmatprep.subr.mxu1 %v1104_v23  ;;  %v299_v5 = vld [vmem:[%s2350_s26 + $0x188] sm:$0xff]  ;;  %v300_v6 = vld [vmem:[%s2350_s26 + $0x190] sm:$0xff]  ;;  %v301_v7 = vld [vmem:[%s2350_s26 + $0x198] sm:$0xff] }
  0x2b   : > { %1999 = vmatpush3.msra.mxu0 %v1103_v24  ;;  %2134 = vmatpush3.msra.mxu1 %v1104_v23  ;;  %v302_v8 = vld [vmem:[%s2350_s26 + $0x1a0] sm:$0xff]  ;;  %v303_v9 = vld [vmem:[%s2350_s26 + $0x1a8] sm:$0xff]  ;;  %v304_v10 = vld [vmem:[%s2350_s26 + $0x1b0] sm:$0xff] }
  0x2c   : > { %1901 = vmatmul.mubr.msk.f32.gmra.mxu0 %vm325_vm0, %v259_v19  ;;  %2000 = vmatprep.subr.mxu0 %v1102_v26  ;;  %v305_v11 = vld [vmem:[%s2350_s26 + $0x1b8] sm:$0xff]  ;;  %v306_v12 = vld [vmem:[%s2350_s26 + $0x1c0] sm:$0xff]  ;;  %v307_v13 = vld [vmem:[%s2350_s26 + $0x1c8] sm:$0xff] }
  0x2d   : > { %1903 = vmatprep.mubr.msk.f32.mxu0 %vm325_vm0, %v260_v20  ;;  %2001 = vmatpush3.msra.mxu0 %v1102_v26  ;;  %v308_v14 = vld [vmem:[%s2350_s26 + $0x1d0] sm:$0xff]  ;;  %v309_v15 = vld [vmem:[%s2350_s26 + $0x1d8] sm:$0xff]  ;;  %v310_v16 = vld [vmem:[%s2350_s26 + $0x1e0] sm:$0xff] }
  0x2e   : > { %2002 = vmatprep.subr.mxu0 %v1101_v28  ;;  %2119 = vmatprep.subr.mxu1 %v1103_v24  ;;  %v311_v17 = vld [vmem:[%s2350_s26 + $0x1e8] sm:$0xff]  ;;  %v312_v18 = vld [vmem:[%s2350_s26 + $0x1f0] sm:$0xff]  ;;  %v313_v19 = vld [vmem:[%s2350_s26 + $0x1f8] sm:$0xff]  ;;  %s228_s26 = sand.u32 1, %s2236_s19  }
  0x2f   : > { %2003 = vmatpush3.msra.mxu0 %v1101_v28  ;;  %2135 = vmatpush3.msra.mxu1 %v1103_v24  ;;  %v2528_v20 = vld [vmem:[%s2796_s2] ss:$0 sm:$0xff]  ;;  %s1653_s10 = sshll.u32 %s228_s26, 9  ;;  %s2734_s14 = scalar_lea.sflag [#allocation3], %s228_s26 }
  0x30   : > { %1904 = vmatmul.mubr.msk.f32.gmra.mxu0 %vm325_vm0, %v261_v21  ;;  %2004 = vmatprep.subr.mxu0 %v1100_v30  ;;  %s2603_s13 = scalar_lea.vmem [#allocation2], %s1653_s10 }
  0x31   : > { %1906 = vmatprep.mubr.msk.f32.mxu0 %vm325_vm0, %v262_v22  ;;  %2005 = vmatpush3.msra.mxu0 %v1100_v30 }
  0x32   : > { %2006 = vmatprep.subr.mxu0 %v1099_v32  ;;  %2120 = vmatprep.subr.mxu1 %v1102_v26 }
  0x33   : > { %2007 = vmatpush3.msra.mxu0 %v1099_v32  ;;  %2136 = vmatpush3.msra.mxu1 %v1102_v26 }
  0x34   : > { %1907 = vmatmul.mubr.msk.f32.gmra.mxu0 %vm325_vm0, %v263_v25  ;;  %2121 = vmatprep.subr.mxu1 %v1101_v28 }
  0x35   : > { %1909 = vmatprep.mubr.msk.f32.mxu0 %vm325_vm0, %v264_v27  ;;  %2137 = vmatpush3.msra.mxu1 %v1101_v28 }
  0x36   : > { %2122 = vmatprep.subr.mxu1 %v1100_v30  ;;  %2008 = vmatprep.subr.mxu0 %v1098_v51 }
  0x37   : > { %2138 = vmatpush3.msra.mxu1 %v1100_v30  ;;  %2009 = vmatpush3.msra.mxu0 %v1098_v51 }
  0x38   : > { %1910 = vmatmul.mubr.msk.f32.gmra.mxu0 %vm325_vm0, %v265_v29  ;;  %2123 = vmatprep.subr.mxu1 %v1099_v32 }
  0x39   : > { %1912 = vmatprep.mubr.msk.f32.mxu0 %vm325_vm0, %v266_v31  ;;  %2139 = vmatpush3.msra.mxu1 %v1099_v32 }
  0x3a   : > { %2124 = vmatprep.subr.mxu1 %v1098_v51  ;;  %2010 = vmatprep.subr.mxu0 %v1097_v54 }
  0x3b   : > { %2140 = vmatpush3.msra.mxu1 %v1098_v51  ;;  %2011 = vmatpush3.msra.mxu0 %v1097_v54 }
  0x3c   : > { %1913 = vmatmul.mubr.msk.f32.gmra.mxu0 %vm325_vm0, %v267_v33  ;;  %2125 = vmatprep.subr.mxu1 %v1097_v54 }
  0x3d   : > { %1915 = vmatprep.mubr.msk.f32.mxu0 %vm325_vm0, %v268_v34  ;;  %2012 = vmatprep.subr.mxu0 %v1096_v55 }
  0x3e   : > { %2141 = vmatpush3.msra.mxu1 %v1097_v54  ;;  %2013 = vmatpush3.msra.mxu0 %v1096_v55 }
  0x3f   : > { %2126 = vmatprep.subr.mxu1 %v1096_v55  ;;  %2014 = vmatprep.subr.mxu0 %v1095_v58 }
  0x40   : > { %1916 = vmatmul.mubr.msk.f32.gmra.mxu0 %vm325_vm0, %v269_v35  ;;  %2142 = vmatpush3.msra.mxu1 %v1096_v55 }
  0x41   : > { %1918 = vmatprep.mubr.msk.f32.mxu0 %vm325_vm0, %v270_v36  ;;  %2015 = vmatpush3.msra.mxu0 %v1095_v58 }
  0x42   : > { %2127 = vmatprep.subr.mxu1 %v1095_v58 }
  0x43   : > { %2143 = vmatpush3.msra.mxu1 %v1095_v58 }
  0x44   : > { %1919 = vmatmul.mubr.msk.f32.gmra.mxu0 %vm325_vm0, %v271_v37 }
  0x45   : > { %1921 = vmatprep.mubr.msk.f32.mxu0 %vm325_vm0, %v272_v38 }
  0x48   : > { %1922 = vmatmul.mubr.msk.f32.gmra.mxu0 %vm325_vm0, %v273_v39 }
  0x49   : > { %1924 = vmatprep.mubr.msk.f32.mxu0 %vm325_vm0, %v274_v40 }
  0x4c   : > { %1925 = vmatmul.mubr.msk.f32.gmra.mxu0 %vm325_vm0, %v275_v41 }
  0x4d   : > { %1927 = vmatprep.mubr.msk.f32.mxu0 %vm325_vm0, %v276_v42 }
  0x50   : > { %1928 = vmatmul.mubr.msk.f32.gmra.mxu0 %vm325_vm0, %v277_v43 }
  0x51   : > { %1930 = vmatprep.mubr.msk.f32.mxu0 %vm325_vm0, %v278_v44 }
  0x54   : > { %1931 = vmatmul.mubr.msk.f32.gmra.mxu0 %vm325_vm0, %v279_v45 }
  0x55   : > { %1933 = vmatprep.mubr.msk.f32.mxu0 %vm325_vm0, %v280_v46 }
  0x58   : > { %1934 = vmatmul.mubr.msk.f32.gmra.mxu0 %vm325_vm0, %v281_v47 }
  0x59   : > { %1936 = vmatprep.mubr.msk.f32.mxu0 %vm325_vm0, %v282_v48 }
  0x5c   : > { %1937 = vmatmul.mubr.msk.f32.gmra.mxu0 %vm325_vm0, %v283_v49 }
  0x5d   : > { %1939 = vmatprep.mubr.msk.f32.mxu0 %vm325_vm0, %v284_v50 }
  0x60   : > { %1940 = vmatmul.mubr.msk.f32.gmra.mxu0 %vm325_vm0, %v285_v52 }
  0x61   : > { %1942 = vmatprep.mubr.msk.f32.mxu0 %vm325_vm0, %v286_v53 }
  0x64   : > { %1943 = vmatmul.mubr.msk.f32.gmra.mxu0 %vm325_vm0, %v287_v56 }
  0x65   : > { %1945 = vmatprep.mubr.msk.f32.mxu0 %vm325_vm0, %v288_v57 }
  0x68   : > { %1946 = vmatmul.mubr.msk.f32.gmra.mxu0 %vm325_vm0, %v289_v59 }
  0x69   : > { %1948 = vmatprep.mubr.msk.f32.mxu0 %vm325_vm0, %v290_v60 }
  0x6c   : > { %1949 = vmatmul.mubr.msk.f32.gmra.mxu0 %vm325_vm0, %v291_v61 }
  0x6d   : > { %1951 = vmatprep.mubr.msk.f32.mxu0 %vm325_vm0, %v292_v62 }
  0x70   : > { %1952 = vmatmul.mubr.msk.f32.gmra.mxu0 %vm325_vm0, %v293_v63 }
  0x71   : > { %1954 = vmatprep.mubr.msk.f32.mxu0 %vm325_vm0, %v294_v0 }
  0x74   : > { %1955 = vmatmul.mubr.msk.f32.gmra.mxu0 %vm325_vm0, %v295_v1 }
  0x75   : > { %1957 = vmatprep.mubr.msk.f32.mxu0 %vm325_vm0, %v296_v2 }
  0x78   : > { %1958 = vmatmul.mubr.msk.f32.gmra.mxu0 %vm325_vm0, %v297_v3 }
  0x79   : > { %1960 = vmatprep.mubr.msk.f32.mxu0 %vm325_vm0, %v298_v4 }
  0x7c   : > { %1961 = vmatmul.mubr.msk.f32.gmra.mxu0 %vm325_vm0, %v299_v5 }
  0x7d   : > { %1963 = vmatprep.mubr.msk.f32.mxu0 %vm325_vm0, %v300_v6 }
  0x80   : > { %1964 = vmatmul.mubr.msk.f32.gmra.mxu0 %vm325_vm0, %v301_v7 }
  0x81   : > { %1966 = vmatprep.mubr.msk.f32.mxu0 %vm325_vm0, %v302_v8 }
  0x84   : > { %1967 = vmatmul.mubr.msk.f32.gmra.mxu0 %vm325_vm0, %v303_v9 }
  0x85   : > { %1969 = vmatprep.mubr.msk.f32.mxu0 %vm325_vm0, %v304_v10 }
  0x88   : > { %1970 = vmatmul.mubr.msk.f32.gmra.mxu0 %vm325_vm0, %v305_v11 }
  0x89   : > { %1972 = vmatprep.mubr.msk.f32.mxu0 %vm325_vm0, %v306_v12 }
  0x8c   : > { %1973 = vmatmul.mubr.msk.f32.gmra.mxu0 %vm325_vm0, %v307_v13 }
  0x8d   : > { %1975 = vmatprep.mubr.msk.f32.mxu0 %vm325_vm0, %v308_v14 }
  0x90   : > { %1976 = vmatmul.mubr.msk.f32.gmra.mxu0 %vm325_vm0, %v309_v15 }
  0x91   : > { %1978 = vmatprep.mubr.msk.f32.mxu0 %vm325_vm0, %v310_v16 }
  0x94   : > { %1979 = vmatmul.mubr.msk.f32.gmra.mxu0 %vm325_vm0, %v311_v17 }
  0x95   : > { %1981 = vmatprep.mubr.msk.f32.mxu0 %vm325_vm0, %v312_v18 }
  0x98   : > { %1982 = vmatmul.mubr.msk.f32.gmra.mxu0 %vm325_vm0, %v313_v19 }
  0xdc   : > { %v1890_v21 = vpop.f32.mrf.mxu0 }
  0xdd   : > { %v590_v22 = vadd.f32 %v1890_v21, %v2528_v20 }
  0xde   : > { %v584_v23 = vpop.f32.mrf.mxu0 }
  0xdf   : > { %v585_v24 = vadd.f32 %v2528_v20, %v584_v23  ;;  %v968_v25 = vmul.f32 0.01, %v590_v22  ;;  %vm904_vm1 = vcmp.gt.f32.partialorder %v590_v22, 0.0 }
  0xe0   : > { %v1893_v26 = vpop.f32.mrf.mxu0 }
  0xe1   : > { %v967_v27 = vmul.f32 0.01, %v585_v24  ;;  %v600_v28 = vadd.f32 %v1893_v26, %v2528_v20  ;;  %vm903_vm2 = vcmp.gt.f32.partialorder %v585_v24, 0.0  ;;  %v1032_v32 = vsel %vm904_vm1, %v590_v22, %v968_v25 }
  0xe2   : > { %v594_v29 = vpop.f32.mrf.mxu0 }
  0xe3   : > { %v595_v30 = vadd.f32 %v2528_v20, %v594_v29  ;;  %v1031_v31 = vsel %vm903_vm2, %v585_v24, %v967_v27  ;;  %v970_v33 = vmul.f32 0.01, %v600_v28  ;;  %vm906_vm4 = vcmp.gt.f32.partialorder %v600_v28, 0.0 }
  0xe4   : > { %v1896_v34 = vpop.f32.mrf.mxu0  ;;  %2016 = vmatprep.mubr.f32.mxu0 %v1031_v31 }
  0xe5   : > { %v969_v35 = vmul.f32 0.01, %v595_v30  ;;  %v610_v36 = vadd.f32 %v1896_v34, %v2528_v20  ;;  %2017 = vmatmul.mubr.f32.vlgmr.msra.gmra.mxu0 %v1032_v32  ;;  %vm905_vm3 = vcmp.gt.f32.partialorder %v595_v30, 0.0  ;;  %v1034_v42 = vsel %vm906_vm4, %v600_v28, %v970_v33 }
  0xe6   : > { %v604_v37 = vpop.f32.mrf.mxu0 }
  0xe7   : > { %v605_v38 = vadd.f32 %v2528_v20, %v604_v37  ;;  %v1033_v39 = vsel %vm905_vm3, %v595_v30, %v969_v35  ;;  %v972_v40 = vmul.f32 0.01, %v610_v36  ;;  %vm908_vm6 = vcmp.gt.f32.partialorder %v610_v36, 0.0 }
  0xe8   : > { %v1899_v41 = vpop.f32.mrf.mxu0  ;;  %2019 = vmatprep.mubr.f32.mxu0 %v1033_v39 }
  0xe9   : > { %v971_v43 = vmul.f32 0.01, %v605_v38  ;;  %v620_v44 = vadd.f32 %v1899_v41, %v2528_v20  ;;  %2020 = vmatmul.mubr.f32.gmra.mxu0 %v1034_v42  ;;  %vm907_vm5 = vcmp.gt.f32.partialorder %v605_v38, 0.0  ;;  %v1036_v50 = vsel %vm908_vm6, %v610_v36, %v972_v40 }
  0xea   : > { %v614_v45 = vpop.f32.mrf.mxu0 }
  0xeb   : > { %v615_v46 = vadd.f32 %v2528_v20, %v614_v45  ;;  %v1035_v47 = vsel %vm907_vm5, %v605_v38, %v971_v43  ;;  %v974_v48 = vmul.f32 0.01, %v620_v44  ;;  %vm910_vm8 = vcmp.gt.f32.partialorder %v620_v44, 0.0 }
  0xec   : > { %v1902_v49 = vpop.f32.mrf.mxu0  ;;  %2022 = vmatprep.mubr.f32.mxu0 %v1035_v47 }
  0xed   : > { %v630_v51 = vadd.f32 %v1902_v49, %v2528_v20  ;;  %2023 = vmatmul.mubr.f32.gmra.mxu0 %v1036_v50  ;;  %vm909_vm7 = vcmp.gt.f32.partialorder %v615_v46, 0.0  ;;  %v973_v52 = vmul.f32 0.01, %v615_v46  ;;  %v1038_v58 = vsel %vm910_vm8, %v620_v44, %v974_v48 }
  0xee   : > { %v624_v53 = vpop.f32.mrf.mxu0 }
  0xef   : > { %v625_v54 = vadd.f32 %v2528_v20, %v624_v53  ;;  %v1037_v55 = vsel %vm909_vm7, %v615_v46, %v973_v52  ;;  %v976_v56 = vmul.f32 0.01, %v630_v51  ;;  %vm912_vm10 = vcmp.gt.f32.partialorder %v630_v51, 0.0 }
  0xf0   : > { %v1905_v57 = vpop.f32.mrf.mxu0  ;;  %2025 = vmatprep.mubr.f32.mxu1 %v1037_v55 }
  0xf1   : > { %v975_v59 = vmul.f32 0.01, %v625_v54  ;;  %v640_v60 = vadd.f32 %v1905_v57, %v2528_v20  ;;  %2026 = vmatmul.mubr.f32.vlgmr.msra.gmra.mxu1 %v1038_v58  ;;  %vm911_vm9 = vcmp.gt.f32.partialorder %v625_v54, 0.0  ;;  %v1040_v2 = vsel %vm912_vm10, %v630_v51, %v976_v56 }
  0xf2   : > { %v634_v61 = vpop.f32.mrf.mxu0 }
  0xf3   : > { %v635_v62 = vadd.f32 %v2528_v20, %v634_v61  ;;  %v1039_v63 = vsel %vm911_vm9, %v625_v54, %v975_v59  ;;  %v978_v0 = vmul.f32 0.01, %v640_v60  ;;  %vm914_vm12 = vcmp.gt.f32.partialorder %v640_v60, 0.0 }
  0xf4   : > { %v1908_v1 = vpop.f32.mrf.mxu0  ;;  %2028 = vmatprep.mubr.f32.mxu1 %v1039_v63 }
  0xf5   : > { %v977_v3 = vmul.f32 0.01, %v635_v62  ;;  %v650_v4 = vadd.f32 %v1908_v1, %v2528_v20  ;;  %2029 = vmatmul.mubr.f32.gmra.mxu1 %v1040_v2  ;;  %vm913_vm11 = vcmp.gt.f32.partialorder %v635_v62, 0.0  ;;  %v1042_v10 = vsel %vm914_vm12, %v640_v60, %v978_v0 }
  0xf6   : > { %v644_v5 = vpop.f32.mrf.mxu0 }
  0xf7   : > { %v645_v6 = vadd.f32 %v2528_v20, %v644_v5  ;;  %v1041_v7 = vsel %vm913_vm11, %v635_v62, %v977_v3  ;;  %v980_v8 = vmul.f32 0.01, %v650_v4  ;;  %vm916_vm14 = vcmp.gt.f32.partialorder %v650_v4, 0.0 }
  0xf8   : > { %v1911_v9 = vpop.f32.mrf.mxu0  ;;  %2031 = vmatprep.mubr.f32.mxu1 %v1041_v7 }
  0xf9   : > { %v979_v11 = vmul.f32 0.01, %v645_v6  ;;  %v660_v12 = vadd.f32 %v1911_v9, %v2528_v20  ;;  %2032 = vmatmul.mubr.f32.gmra.mxu1 %v1042_v10  ;;  %vm915_vm13 = vcmp.gt.f32.partialorder %v645_v6, 0.0  ;;  %v1044_v18 = vsel %vm916_vm14, %v650_v4, %v980_v8 }
  0xfa   : > { %v654_v13 = vpop.f32.mrf.mxu0 }
  0xfb   : > { %v655_v14 = vadd.f32 %v2528_v20, %v654_v13  ;;  %v1043_v15 = vsel %vm915_vm13, %v645_v6, %v979_v11  ;;  %v982_v16 = vmul.f32 0.01, %v660_v12  ;;  %vm918_vm0 = vcmp.gt.f32.partialorder %v660_v12, 0.0 }
  0xfc   : > { %v1914_v17 = vpop.f32.mrf.mxu0  ;;  %2034 = vmatprep.mubr.f32.mxu1 %v1043_v15 }
  0xfd   : > { %v981_v19 = vmul.f32 0.01, %v655_v14  ;;  %v670_v21 = vadd.f32 %v1914_v17, %v2528_v20  ;;  %2035 = vmatmul.mubr.f32.gmra.mxu1 %v1044_v18  ;;  %vm917_vm15 = vcmp.gt.f32.partialorder %v655_v14, 0.0  ;;  %v1046_v27 = vsel %vm918_vm0, %v660_v12, %v982_v16 }
  0xfe   : > { %v664_v22 = vpop.f32.mrf.mxu0 }
  0xff   : > { %v665_v23 = vadd.f32 %v2528_v20, %v664_v22  ;;  %v1045_v24 = vsel %vm917_vm15, %v655_v14, %v981_v19  ;;  %v984_v25 = vmul.f32 0.01, %v670_v21  ;;  %vm920_vm2 = vcmp.gt.f32.partialorder %v670_v21, 0.0 }
 0x100   : > { %v1917_v26 = vpop.f32.mrf.mxu0  ;;  %2037 = vmatprep.mubr.f32.mxu1 %v1045_v24 }
 0x101   : > { %v983_v28 = vmul.f32 0.01, %v665_v23  ;;  %v680_v29 = vadd.f32 %v1917_v26, %v2528_v20  ;;  %2038 = vmatmul.mubr.f32.gmra.mxu1 %v1046_v27  ;;  %vm919_vm1 = vcmp.gt.f32.partialorder %v665_v23, 0.0  ;;  %v1048_v35 = vsel %vm920_vm2, %v670_v21, %v984_v25 }
 0x102   : > { %v674_v30 = vpop.f32.mrf.mxu0 }
 0x103   : > { %v675_v31 = vadd.f32 %v2528_v20, %v674_v30  ;;  %v1047_v32 = vsel %vm919_vm1, %v665_v23, %v983_v28  ;;  %v986_v33 = vmul.f32 0.01, %v680_v29  ;;  %vm922_vm4 = vcmp.gt.f32.partialorder %v680_v29, 0.0 }
 0x104   : > { %v1920_v34 = vpop.f32.mrf.mxu0  ;;  %2040 = vmatprep.mubr.f32.mxu1 %v1047_v32 }
 0x105   : > { %v985_v36 = vmul.f32 0.01, %v675_v31  ;;  %v690_v37 = vadd.f32 %v1920_v34, %v2528_v20  ;;  %2041 = vmatmul.mubr.f32.gmra.mxu1 %v1048_v35  ;;  %vm921_vm3 = vcmp.gt.f32.partialorder %v675_v31, 0.0  ;;  %v1050_v43 = vsel %vm922_vm4, %v680_v29, %v986_v33 }
 0x106   : > { %v684_v38 = vpop.f32.mrf.mxu0 }
 0x107   : > { %v685_v39 = vadd.f32 %v2528_v20, %v684_v38  ;;  %v1049_v40 = vsel %vm921_vm3, %v675_v31, %v985_v36  ;;  %v988_v41 = vmul.f32 0.01, %v690_v37  ;;  %vm924_vm6 = vcmp.gt.f32.partialorder %v690_v37, 0.0 }
 0x108   : > { %v1923_v42 = vpop.f32.mrf.mxu0  ;;  %2043 = vmatprep.mubr.f32.mxu1 %v1049_v40 }
 0x109   : > { %v987_v44 = vmul.f32 0.01, %v685_v39  ;;  %v700_v45 = vadd.f32 %v1923_v42, %v2528_v20  ;;  %2044 = vmatmul.mubr.f32.gmra.mxu1 %v1050_v43  ;;  %vm923_vm5 = vcmp.gt.f32.partialorder %v685_v39, 0.0  ;;  %v1052_v51 = vsel %vm924_vm6, %v690_v37, %v988_v41 }
 0x10a   : > { %v694_v46 = vpop.f32.mrf.mxu0 }
 0x10b   : > { %v695_v47 = vadd.f32 %v2528_v20, %v694_v46  ;;  %v1051_v48 = vsel %vm923_vm5, %v685_v39, %v987_v44  ;;  %v990_v49 = vmul.f32 0.01, %v700_v45  ;;  %vm926_vm8 = vcmp.gt.f32.partialorder %v700_v45, 0.0 }
 0x10c   : > { %v1926_v50 = vpop.f32.mrf.mxu0  ;;  %2046 = vmatprep.mubr.f32.mxu1 %v1051_v48 }
 0x10d   : > { %v989_v52 = vmul.f32 0.01, %v695_v47  ;;  %v710_v53 = vadd.f32 %v1926_v50, %v2528_v20  ;;  %2047 = vmatmul.mubr.f32.gmra.mxu1 %v1052_v51  ;;  %vm925_vm7 = vcmp.gt.f32.partialorder %v695_v47, 0.0  ;;  %v1054_v59 = vsel %vm926_vm8, %v700_v45, %v990_v49 }
 0x10e   : > { %v704_v54 = vpop.f32.mrf.mxu0 }
 0x10f   : > { %v705_v55 = vadd.f32 %v2528_v20, %v704_v54  ;;  %v1053_v56 = vsel %vm925_vm7, %v695_v47, %v989_v52  ;;  %v992_v57 = vmul.f32 0.01, %v710_v53  ;;  %vm928_vm10 = vcmp.gt.f32.partialorder %v710_v53, 0.0 }
 0x110   : > { %v1929_v58 = vpop.f32.mrf.mxu0  ;;  %2049 = vmatprep.mubr.f32.mxu1 %v1053_v56 }
 0x111   : > { %v991_v60 = vmul.f32 0.01, %v705_v55  ;;  %v720_v61 = vadd.f32 %v1929_v58, %v2528_v20  ;;  %2050 = vmatmul.mubr.f32.gmra.mxu1 %v1054_v59  ;;  %vm927_vm9 = vcmp.gt.f32.partialorder %v705_v55, 0.0  ;;  %v1056_v3 = vsel %vm928_vm10, %v710_v53, %v992_v57 }
 0x112   : > { %v714_v62 = vpop.f32.mrf.mxu0 }
 0x113   : > { %v715_v63 = vadd.f32 %v2528_v20, %v714_v62  ;;  %v1055_v0 = vsel %vm927_vm9, %v705_v55, %v991_v60  ;;  %v994_v1 = vmul.f32 0.01, %v720_v61  ;;  %vm930_vm12 = vcmp.gt.f32.partialorder %v720_v61, 0.0 }
 0x114   : > { %v1932_v2 = vpop.f32.mrf.mxu0  ;;  %2052 = vmatprep.mubr.f32.mxu1 %v1055_v0 }
 0x115   : > { %v993_v4 = vmul.f32 0.01, %v715_v63  ;;  %v730_v5 = vadd.f32 %v1932_v2, %v2528_v20  ;;  %2053 = vmatmul.mubr.f32.gmra.mxu1 %v1056_v3  ;;  %vm929_vm11 = vcmp.gt.f32.partialorder %v715_v63, 0.0  ;;  %v1058_v11 = vsel %vm930_vm12, %v720_v61, %v994_v1 }
 0x116   : > { %v724_v6 = vpop.f32.mrf.mxu0 }
 0x117   : > { %v725_v7 = vadd.f32 %v2528_v20, %v724_v6  ;;  %v1057_v8 = vsel %vm929_vm11, %v715_v63, %v993_v4  ;;  %v996_v9 = vmul.f32 0.01, %v730_v5  ;;  %vm932_vm14 = vcmp.gt.f32.partialorder %v730_v5, 0.0 }
 0x118   : > { %v1935_v10 = vpop.f32.mrf.mxu0  ;;  %2055 = vmatprep.mubr.f32.mxu1 %v1057_v8 }
 0x119   : > { %v995_v12 = vmul.f32 0.01, %v725_v7  ;;  %v740_v13 = vadd.f32 %v1935_v10, %v2528_v20  ;;  %2056 = vmatmul.mubr.f32.gmra.mxu1 %v1058_v11  ;;  %vm931_vm13 = vcmp.gt.f32.partialorder %v725_v7, 0.0  ;;  %v1060_v19 = vsel %vm932_vm14, %v730_v5, %v996_v9 }
 0x11a   : > { %v734_v14 = vpop.f32.mrf.mxu0 }
 0x11b   : > { %v735_v15 = vadd.f32 %v2528_v20, %v734_v14  ;;  %v1059_v16 = vsel %vm931_vm13, %v725_v7, %v995_v12  ;;  %v998_v17 = vmul.f32 0.01, %v740_v13  ;;  %vm934_vm0 = vcmp.gt.f32.partialorder %v740_v13, 0.0 }
 0x11c   : > { %v1938_v18 = vpop.f32.mrf.mxu0  ;;  %2058 = vmatprep.mubr.f32.mxu1 %v1059_v16 }
 0x11d   : > { %v997_v21 = vmul.f32 0.01, %v735_v15  ;;  %v750_v22 = vadd.f32 %v1938_v18, %v2528_v20  ;;  %2059 = vmatmul.mubr.f32.gmra.mxu1 %v1060_v19  ;;  %vm933_vm15 = vcmp.gt.f32.partialorder %v735_v15, 0.0  ;;  %v1062_v28 = vsel %vm934_vm0, %v740_v13, %v998_v17 }
 0x11e   : > { %v744_v23 = vpop.f32.mrf.mxu0 }
 0x11f   : > { %v745_v24 = vadd.f32 %v2528_v20, %v744_v23  ;;  %v1061_v25 = vsel %vm933_vm15, %v735_v15, %v997_v21  ;;  %v1000_v26 = vmul.f32 0.01, %v750_v22  ;;  %vm936_vm2 = vcmp.gt.f32.partialorder %v750_v22, 0.0 }
 0x120   : > { %v1941_v27 = vpop.f32.mrf.mxu0  ;;  %2061 = vmatprep.mubr.f32.mxu1 %v1061_v25 }
 0x121   : > { %v999_v29 = vmul.f32 0.01, %v745_v24  ;;  %v760_v30 = vadd.f32 %v1941_v27, %v2528_v20  ;;  %2062 = vmatmul.mubr.f32.gmra.mxu1 %v1062_v28  ;;  %vm935_vm1 = vcmp.gt.f32.partialorder %v745_v24, 0.0  ;;  %v1064_v36 = vsel %vm936_vm2, %v750_v22, %v1000_v26 }
 0x122   : > { %v754_v31 = vpop.f32.mrf.mxu0 }
 0x123   : > { %v755_v32 = vadd.f32 %v2528_v20, %v754_v31  ;;  %v1063_v33 = vsel %vm935_vm1, %v745_v24, %v999_v29  ;;  %v1002_v34 = vmul.f32 0.01, %v760_v30  ;;  %vm938_vm4 = vcmp.gt.f32.partialorder %v760_v30, 0.0 }
 0x124   : > { %v1944_v35 = vpop.f32.mrf.mxu0  ;;  %2064 = vmatprep.mubr.f32.mxu1 %v1063_v33 }
 0x125   : > { %v1001_v37 = vmul.f32 0.01, %v755_v32  ;;  %v770_v38 = vadd.f32 %v1944_v35, %v2528_v20  ;;  %2065 = vmatmul.mubr.f32.gmra.mxu1 %v1064_v36  ;;  %vm937_vm3 = vcmp.gt.f32.partialorder %v755_v32, 0.0  ;;  %v1066_v44 = vsel %vm938_vm4, %v760_v30, %v1002_v34 }
 0x126   : > { %v764_v39 = vpop.f32.mrf.mxu0 }
 0x127   : > { %v765_v40 = vadd.f32 %v2528_v20, %v764_v39  ;;  %v1065_v41 = vsel %vm937_vm3, %v755_v32, %v1001_v37  ;;  %v1004_v42 = vmul.f32 0.01, %v770_v38  ;;  %vm940_vm6 = vcmp.gt.f32.partialorder %v770_v38, 0.0 }
 0x128   : > { %v1947_v43 = vpop.f32.mrf.mxu0  ;;  %2067 = vmatprep.mubr.f32.mxu1 %v1065_v41 }
 0x129   : > { %v1003_v45 = vmul.f32 0.01, %v765_v40  ;;  %v780_v46 = vadd.f32 %v1947_v43, %v2528_v20  ;;  %2068 = vmatmul.mubr.f32.gmra.mxu1 %v1066_v44  ;;  %vm939_vm5 = vcmp.gt.f32.partialorder %v765_v40, 0.0  ;;  %v1068_v52 = vsel %vm940_vm6, %v770_v38, %v1004_v42 }
 0x12a   : > { %v774_v47 = vpop.f32.mrf.mxu0 }
 0x12b   : > { %v775_v48 = vadd.f32 %v2528_v20, %v774_v47  ;;  %v1067_v49 = vsel %vm939_vm5, %v765_v40, %v1003_v45  ;;  %v1006_v50 = vmul.f32 0.01, %v780_v46  ;;  %vm942_vm8 = vcmp.gt.f32.partialorder %v780_v46, 0.0 }
 0x12c   : > { %v1950_v51 = vpop.f32.mrf.mxu0  ;;  %2070 = vmatprep.mubr.f32.mxu1 %v1067_v49 }
 0x12d   : > { %v1005_v53 = vmul.f32 0.01, %v775_v48  ;;  %v790_v54 = vadd.f32 %v1950_v51, %v2528_v20  ;;  %2071 = vmatmul.mubr.f32.gmra.mxu1 %v1068_v52  ;;  %vm941_vm7 = vcmp.gt.f32.partialorder %v775_v48, 0.0  ;;  %v1070_v60 = vsel %vm942_vm8, %v780_v46, %v1006_v50 }
 0x12e   : > { %v784_v55 = vpop.f32.mrf.mxu0 }
 0x12f   : > { %v785_v56 = vadd.f32 %v2528_v20, %v784_v55  ;;  %v1069_v57 = vsel %vm941_vm7, %v775_v48, %v1005_v53  ;;  %v1008_v58 = vmul.f32 0.01, %v790_v54  ;;  %vm944_vm10 = vcmp.gt.f32.partialorder %v790_v54, 0.0 }
 0x130   : > { %v1953_v59 = vpop.f32.mrf.mxu0  ;;  %2073 = vmatprep.mubr.f32.mxu1 %v1069_v57 }
 0x131   : > { %v1007_v61 = vmul.f32 0.01, %v785_v56  ;;  %v800_v62 = vadd.f32 %v1953_v59, %v2528_v20  ;;  %2074 = vmatmul.mubr.f32.gmra.mxu1 %v1070_v60  ;;  %vm943_vm9 = vcmp.gt.f32.partialorder %v785_v56, 0.0  ;;  %v1072_v4 = vsel %vm944_vm10, %v790_v54, %v1008_v58 }
 0x132   : > { %v794_v63 = vpop.f32.mrf.mxu0 }
 0x133   : > { %v795_v0 = vadd.f32 %v2528_v20, %v794_v63  ;;  %v1071_v1 = vsel %vm943_vm9, %v785_v56, %v1007_v61  ;;  %v1010_v2 = vmul.f32 0.01, %v800_v62  ;;  %vm946_vm12 = vcmp.gt.f32.partialorder %v800_v62, 0.0 }
 0x134   : > { %v1956_v3 = vpop.f32.mrf.mxu0  ;;  %2076 = vmatprep.mubr.f32.mxu1 %v1071_v1 }
 0x135   : > { %v1009_v5 = vmul.f32 0.01, %v795_v0  ;;  %v810_v6 = vadd.f32 %v1956_v3, %v2528_v20  ;;  %2077 = vmatmul.mubr.f32.gmra.mxu1 %v1072_v4  ;;  %vm945_vm11 = vcmp.gt.f32.partialorder %v795_v0, 0.0  ;;  %v1074_v12 = vsel %vm946_vm12, %v800_v62, %v1010_v2 }
 0x136   : > { %v804_v7 = vpop.f32.mrf.mxu0 }
 0x137   : > { %v805_v8 = vadd.f32 %v2528_v20, %v804_v7  ;;  %v1073_v9 = vsel %vm945_vm11, %v795_v0, %v1009_v5  ;;  %v1012_v10 = vmul.f32 0.01, %v810_v6  ;;  %vm948_vm14 = vcmp.gt.f32.partialorder %v810_v6, 0.0 }
 0x138   : > { %v1959_v11 = vpop.f32.mrf.mxu0  ;;  %2079 = vmatprep.mubr.f32.mxu1 %v1073_v9 }
 0x139   : > { %v1011_v13 = vmul.f32 0.01, %v805_v8  ;;  %v820_v14 = vadd.f32 %v1959_v11, %v2528_v20  ;;  %2080 = vmatmul.mubr.f32.gmra.mxu1 %v1074_v12  ;;  %vm947_vm13 = vcmp.gt.f32.partialorder %v805_v8, 0.0  ;;  %v1076_v21 = vsel %vm948_vm14, %v810_v6, %v1012_v10 }
 0x13a   : > { %v814_v15 = vpop.f32.mrf.mxu0 }
 0x13b   : > { %v815_v16 = vadd.f32 %v2528_v20, %v814_v15  ;;  %v1075_v17 = vsel %vm947_vm13, %v805_v8, %v1011_v13  ;;  %v1014_v18 = vmul.f32 0.01, %v820_v14  ;;  %vm950_vm0 = vcmp.gt.f32.partialorder %v820_v14, 0.0 }
 0x13c   : > { %v1962_v19 = vpop.f32.mrf.mxu0  ;;  %2082 = vmatprep.mubr.f32.mxu1 %v1075_v17 }
 0x13d   : > { %v1013_v22 = vmul.f32 0.01, %v815_v16  ;;  %v830_v23 = vadd.f32 %v1962_v19, %v2528_v20  ;;  %2083 = vmatmul.mubr.f32.gmra.mxu1 %v1076_v21  ;;  %vm949_vm15 = vcmp.gt.f32.partialorder %v815_v16, 0.0  ;;  %v1078_v29 = vsel %vm950_vm0, %v820_v14, %v1014_v18 }
 0x13e   : > { %v824_v24 = vpop.f32.mrf.mxu0 }
 0x13f   : > { %v825_v25 = vadd.f32 %v2528_v20, %v824_v24  ;;  %v1077_v26 = vsel %vm949_vm15, %v815_v16, %v1013_v22  ;;  %v1016_v27 = vmul.f32 0.01, %v830_v23  ;;  %vm952_vm2 = vcmp.gt.f32.partialorder %v830_v23, 0.0 }
 0x140   : > { %v1965_v28 = vpop.f32.mrf.mxu0  ;;  %2085 = vmatprep.mubr.f32.mxu1 %v1077_v26 }
 0x141   : > { %v1015_v30 = vmul.f32 0.01, %v825_v25  ;;  %v840_v31 = vadd.f32 %v1965_v28, %v2528_v20  ;;  %2086 = vmatmul.mubr.f32.gmra.mxu1 %v1078_v29  ;;  %vm951_vm1 = vcmp.gt.f32.partialorder %v825_v25, 0.0  ;;  %v1080_v37 = vsel %vm952_vm2, %v830_v23, %v1016_v27 }
 0x142   : > { %v834_v32 = vpop.f32.mrf.mxu0 }
 0x143   : > { %v835_v33 = vadd.f32 %v2528_v20, %v834_v32  ;;  %v1079_v34 = vsel %vm951_vm1, %v825_v25, %v1015_v30  ;;  %v1018_v35 = vmul.f32 0.01, %v840_v31  ;;  %vm954_vm4 = vcmp.gt.f32.partialorder %v840_v31, 0.0  ;;  %v2600_v25 = vld [vmem:[%s2798_s4] ss:$0 sm:$0xff] }
 0x144   : > { %v1968_v36 = vpop.f32.mrf.mxu0  ;;  %2088 = vmatprep.mubr.f32.mxu1 %v1079_v34 }
 0x145   : > { %v1017_v38 = vmul.f32 0.01, %v835_v33  ;;  %v850_v39 = vadd.f32 %v1968_v36, %v2528_v20  ;;  %2089 = vmatmul.mubr.f32.gmra.mxu1 %v1080_v37  ;;  %vm953_vm3 = vcmp.gt.f32.partialorder %v835_v33, 0.0  ;;  %v1082_v45 = vsel %vm954_vm4, %v840_v31, %v1018_v35 }
 0x146   : > { %v844_v40 = vpop.f32.mrf.mxu0 }
 0x147   : > { %v845_v41 = vadd.f32 %v2528_v20, %v844_v40  ;;  %v1081_v42 = vsel %vm953_vm3, %v835_v33, %v1017_v38  ;;  %v1020_v43 = vmul.f32 0.01, %v850_v39  ;;  %vm956_vm6 = vcmp.gt.f32.partialorder %v850_v39, 0.0 }
 0x148   : > { %v1971_v44 = vpop.f32.mrf.mxu0  ;;  %2091 = vmatprep.mubr.f32.mxu1 %v1081_v42 }
 0x149   : > { %v1019_v46 = vmul.f32 0.01, %v845_v41  ;;  %v860_v47 = vadd.f32 %v1971_v44, %v2528_v20  ;;  %2092 = vmatmul.mubr.f32.gmra.mxu1 %v1082_v45  ;;  %vm955_vm5 = vcmp.gt.f32.partialorder %v845_v41, 0.0  ;;  %v1084_v53 = vsel %vm956_vm6, %v850_v39, %v1020_v43 }
 0x14a   : > { %v854_v48 = vpop.f32.mrf.mxu0 }
 0x14b   : > { %v855_v49 = vadd.f32 %v2528_v20, %v854_v48  ;;  %v1083_v50 = vsel %vm955_vm5, %v845_v41, %v1019_v46  ;;  %v1022_v51 = vmul.f32 0.01, %v860_v47  ;;  %vm958_vm8 = vcmp.gt.f32.partialorder %v860_v47, 0.0 }
 0x14c   : > { %v1974_v52 = vpop.f32.mrf.mxu0  ;;  %2094 = vmatprep.mubr.f32.mxu1 %v1083_v50 }
 0x14d   : > { %v1021_v54 = vmul.f32 0.01, %v855_v49  ;;  %v870_v55 = vadd.f32 %v1974_v52, %v2528_v20  ;;  %2095 = vmatmul.mubr.f32.gmra.mxu1 %v1084_v53  ;;  %vm957_vm7 = vcmp.gt.f32.partialorder %v855_v49, 0.0  ;;  %v1086_v61 = vsel %vm958_vm8, %v860_v47, %v1022_v51 }
 0x14e   : > { %v864_v56 = vpop.f32.mrf.mxu0 }
 0x14f   : > { %v865_v57 = vadd.f32 %v2528_v20, %v864_v56  ;;  %v1085_v58 = vsel %vm957_vm7, %v855_v49, %v1021_v54  ;;  %v1024_v59 = vmul.f32 0.01, %v870_v55  ;;  %vm960_vm10 = vcmp.gt.f32.partialorder %v870_v55, 0.0 }
 0x150   : > { %v1977_v60 = vpop.f32.mrf.mxu0  ;;  %2097 = vmatprep.mubr.f32.mxu1 %v1085_v58 }
 0x151   : > { %v1023_v62 = vmul.f32 0.01, %v865_v57  ;;  %v880_v63 = vadd.f32 %v1977_v60, %v2528_v20  ;;  %2098 = vmatmul.mubr.f32.gmra.mxu1 %v1086_v61  ;;  %vm959_vm9 = vcmp.gt.f32.partialorder %v865_v57, 0.0  ;;  %v1088_v5 = vsel %vm960_vm10, %v870_v55, %v1024_v59 }
 0x152   : > { %v874_v0 = vpop.f32.mrf.mxu0 }
 0x153   : > { %v875_v1 = vadd.f32 %v2528_v20, %v874_v0  ;;  %v1087_v2 = vsel %vm959_vm9, %v865_v57, %v1023_v62  ;;  %v1026_v3 = vmul.f32 0.01, %v880_v63  ;;  %vm962_vm12 = vcmp.gt.f32.partialorder %v880_v63, 0.0 }
 0x154   : > { %v1980_v4 = vpop.f32.mrf.mxu0  ;;  %2100 = vmatprep.mubr.f32.mxu1 %v1087_v2 }
 0x155   : > { %v1025_v6 = vmul.f32 0.01, %v875_v1  ;;  %v890_v7 = vadd.f32 %v1980_v4, %v2528_v20  ;;  %2101 = vmatmul.mubr.f32.gmra.mxu1 %v1088_v5  ;;  %vm961_vm11 = vcmp.gt.f32.partialorder %v875_v1, 0.0  ;;  %v1090_v13 = vsel %vm962_vm12, %v880_v63, %v1026_v3 }
 0x156   : > { %v884_v8 = vpop.f32.mrf.mxu0 }
 0x157   : > { %v885_v9 = vadd.f32 %v2528_v20, %v884_v8  ;;  %v1089_v10 = vsel %vm961_vm11, %v875_v1, %v1025_v6  ;;  %v1028_v11 = vmul.f32 0.01, %v890_v7  ;;  %vm964_vm14 = vcmp.gt.f32.partialorder %v890_v7, 0.0 }
 0x158   : > { %v1983_v12 = vpop.f32.mrf.mxu0  ;;  %2103 = vmatprep.mubr.f32.mxu1 %v1089_v10 }
 0x159   : > { %v1027_v14 = vmul.f32 0.01, %v885_v9  ;;  %v900_v15 = vadd.f32 %v1983_v12, %v2528_v20  ;;  %2104 = vmatmul.mubr.f32.gmra.mxu1 %v1090_v13  ;;  %vm963_vm13 = vcmp.gt.f32.partialorder %v885_v9, 0.0  ;;  %v1092_v21 = vsel %vm964_vm14, %v890_v7, %v1028_v11 }
 0x15a   : > { %v894_v16 = vpop.f32.mrf.mxu0 }
 0x15b   : > { %v895_v17 = vadd.f32 %v2528_v20, %v894_v16  ;;  %v1091_v18 = vsel %vm963_vm13, %v885_v9, %v1027_v14  ;;  %v1030_v19 = vmul.f32 0.01, %v900_v15  ;;  %vm966_vm0 = vcmp.gt.f32.partialorder %v900_v15, 0.0 }
 0x15c   : > { %2106 = vmatprep.mubr.f32.mxu1 %v1091_v18 }
 0x15d   : > { %v1029_v22 = vmul.f32 0.01, %v895_v17  ;;  %2107 = vmatmul.mubr.f32.gmra.mxu1 %v1092_v21  ;;  %vm965_vm15 = vcmp.gt.f32.partialorder %v895_v17, 0.0  ;;  %v1094_v24 = vsel %vm966_vm0, %v900_v15, %v1030_v19 }
 0x15f   : > { %v1093_v23 = vsel %vm965_vm15, %v895_v17, %v1029_v22 }
 0x160   : > { %2109 = vmatprep.mubr.f32.mxu1 %v1093_v23 }
 0x161   : > { %2110 = vmatmul.mubr.f32.gmra.mxu1 %v1094_v24 }
 0x1a5   : > { %v2018_v20 = vpop.f32.mrf.mxu0 }
 0x1a6   : > { %v1190_v26 = vadd.f32 %v2018_v20, %v2600_v25 }
 0x1a7   : > { %v1184_v27 = vpop.f32.mrf.mxu0 }
 0x1a8   : > { %1504 = vst [vmem:[%s2603_s13 + $0x8] sm:$0xff] %v1190_v26  ;;  %v1185_v28 = vadd.f32 %v2600_v25, %v1184_v27 }
 0x1a9   : > { %v2021_v29 = vpop.f32.mrf.mxu0 }
 0x1aa   : > { %1503 = vst [vmem:[%s2603_s13] sm:$0xff] %v1185_v28  ;;  %v1200_v30 = vadd.f32 %v2021_v29, %v2600_v25 }
 0x1ab   : > { %v1194_v31 = vpop.f32.mrf.mxu0 }
 0x1ac   : > { %1506 = vst [vmem:[%s2603_s13 + $0x18] sm:$0xff] %v1200_v30  ;;  %v1195_v32 = vadd.f32 %v2600_v25, %v1194_v31 }
 0x1ad   : > { %v2024_v33 = vpop.f32.mrf.mxu0 }
 0x1ae   : > { %1505 = vst [vmem:[%s2603_s13 + $0x10] sm:$0xff] %v1195_v32  ;;  %v1210_v34 = vadd.f32 %v2024_v33, %v2600_v25 }
 0x1af   : > { %v1204_v35 = vpop.f32.mrf.mxu0 }
 0x1b0   : > { %1508 = vst [vmem:[%s2603_s13 + $0x28] sm:$0xff] %v1210_v34  ;;  %v1205_v36 = vadd.f32 %v2600_v25, %v1204_v35 }
 0x1b1   : > { %v2027_v37 = vpop.f32.mrf.mxu1 }
 0x1b2   : > { %1507 = vst [vmem:[%s2603_s13 + $0x20] sm:$0xff] %v1205_v36  ;;  %v1220_v38 = vadd.f32 %v2027_v37, %v2600_v25 }
 0x1b3   : > { %v1214_v39 = vpop.f32.mrf.mxu1 }
 0x1b4   : > { %1510 = vst [vmem:[%s2603_s13 + $0x38] sm:$0xff] %v1220_v38  ;;  %v1215_v40 = vadd.f32 %v2600_v25, %v1214_v39 }
 0x1b5   : > { %v2030_v41 = vpop.f32.mrf.mxu1 }
 0x1b6   : > { %1509 = vst [vmem:[%s2603_s13 + $0x30] sm:$0xff] %v1215_v40  ;;  %v1230_v42 = vadd.f32 %v2030_v41, %v2600_v25 }
 0x1b7   : > { %v1224_v43 = vpop.f32.mrf.mxu1 }
 0x1b8   : > { %1512 = vst [vmem:[%s2603_s13 + $0x48] sm:$0xff] %v1230_v42  ;;  %v1225_v44 = vadd.f32 %v2600_v25, %v1224_v43 }
 0x1b9   : > { %v2033_v45 = vpop.f32.mrf.mxu1 }
 0x1ba   : > { %1511 = vst [vmem:[%s2603_s13 + $0x40] sm:$0xff] %v1225_v44  ;;  %v1240_v46 = vadd.f32 %v2033_v45, %v2600_v25 }
 0x1bb   : > { %v1234_v47 = vpop.f32.mrf.mxu1 }
 0x1bc   : > { %1514 = vst [vmem:[%s2603_s13 + $0x58] sm:$0xff] %v1240_v46  ;;  %v1235_v48 = vadd.f32 %v2600_v25, %v1234_v47 }
 0x1bd   : > { %v2036_v49 = vpop.f32.mrf.mxu1 }
 0x1be   : > { %1513 = vst [vmem:[%s2603_s13 + $0x50] sm:$0xff] %v1235_v48  ;;  %v1250_v50 = vadd.f32 %v2036_v49, %v2600_v25 }
 0x1bf   : > { %v1244_v51 = vpop.f32.mrf.mxu1 }
 0x1c0   : > { %1516 = vst [vmem:[%s2603_s13 + $0x68] sm:$0xff] %v1250_v50  ;;  %v1245_v52 = vadd.f32 %v2600_v25, %v1244_v51 }
 0x1c1   : > { %v2039_v53 = vpop.f32.mrf.mxu1 }
 0x1c2   : > { %1515 = vst [vmem:[%s2603_s13 + $0x60] sm:$0xff] %v1245_v52  ;;  %v1260_v54 = vadd.f32 %v2039_v53, %v2600_v25 }
 0x1c3   : > { %v1254_v55 = vpop.f32.mrf.mxu1 }
 0x1c4   : > { %1518 = vst [vmem:[%s2603_s13 + $0x78] sm:$0xff] %v1260_v54  ;;  %v1255_v56 = vadd.f32 %v2600_v25, %v1254_v55 }
 0x1c5   : > { %v2042_v57 = vpop.f32.mrf.mxu1 }
 0x1c6   : > { %1517 = vst [vmem:[%s2603_s13 + $0x70] sm:$0xff] %v1255_v56  ;;  %v1270_v58 = vadd.f32 %v2042_v57, %v2600_v25 }
 0x1c7   : > { %v1264_v59 = vpop.f32.mrf.mxu1 }
 0x1c8   : > { %1520 = vst [vmem:[%s2603_s13 + $0x88] sm:$0xff] %v1270_v58  ;;  %v1265_v60 = vadd.f32 %v2600_v25, %v1264_v59 }
 0x1c9   : > { %v2045_v61 = vpop.f32.mrf.mxu1 }
 0x1ca   : > { %1519 = vst [vmem:[%s2603_s13 + $0x80] sm:$0xff] %v1265_v60  ;;  %v1280_v62 = vadd.f32 %v2045_v61, %v2600_v25 }
 0x1cb   : > { %v1274_v63 = vpop.f32.mrf.mxu1 }
 0x1cc   : > { %1522 = vst [vmem:[%s2603_s13 + $0x98] sm:$0xff] %v1280_v62  ;;  %v1275_v0 = vadd.f32 %v2600_v25, %v1274_v63 }
 0x1cd   : > { %v2048_v1 = vpop.f32.mrf.mxu1 }
 0x1ce   : > { %1521 = vst [vmem:[%s2603_s13 + $0x90] sm:$0xff] %v1275_v0  ;;  %v1290_v2 = vadd.f32 %v2048_v1, %v2600_v25 }
 0x1cf   : > { %v1284_v3 = vpop.f32.mrf.mxu1 }
 0x1d0   : > { %1524 = vst [vmem:[%s2603_s13 + $0xa8] sm:$0xff] %v1290_v2  ;;  %v1285_v4 = vadd.f32 %v2600_v25, %v1284_v3 }
 0x1d1   : > { %v2051_v5 = vpop.f32.mrf.mxu1 }
 0x1d2   : > { %1523 = vst [vmem:[%s2603_s13 + $0xa0] sm:$0xff] %v1285_v4  ;;  %v1300_v6 = vadd.f32 %v2051_v5, %v2600_v25 }
 0x1d3   : > { %v1294_v7 = vpop.f32.mrf.mxu1 }
 0x1d4   : > { %1526 = vst [vmem:[%s2603_s13 + $0xb8] sm:$0xff] %v1300_v6  ;;  %v1295_v8 = vadd.f32 %v2600_v25, %v1294_v7 }
 0x1d5   : > { %v2054_v9 = vpop.f32.mrf.mxu1 }
 0x1d6   : > { %1525 = vst [vmem:[%s2603_s13 + $0xb0] sm:$0xff] %v1295_v8  ;;  %v1310_v10 = vadd.f32 %v2054_v9, %v2600_v25 }
 0x1d7   : > { %v1304_v11 = vpop.f32.mrf.mxu1 }
 0x1d8   : > { %1528 = vst [vmem:[%s2603_s13 + $0xc8] sm:$0xff] %v1310_v10  ;;  %v1305_v12 = vadd.f32 %v2600_v25, %v1304_v11 }
 0x1d9   : > { %v2057_v13 = vpop.f32.mrf.mxu1 }
 0x1da   : > { %1527 = vst [vmem:[%s2603_s13 + $0xc0] sm:$0xff] %v1305_v12  ;;  %v1320_v14 = vadd.f32 %v2057_v13, %v2600_v25 }
 0x1db   : > { %v1314_v15 = vpop.f32.mrf.mxu1 }
 0x1dc   : > { %1530 = vst [vmem:[%s2603_s13 + $0xd8] sm:$0xff] %v1320_v14  ;;  %v1315_v16 = vadd.f32 %v2600_v25, %v1314_v15 }
 0x1dd   : > { %v2060_v17 = vpop.f32.mrf.mxu1 }
 0x1de   : > { %1529 = vst [vmem:[%s2603_s13 + $0xd0] sm:$0xff] %v1315_v16  ;;  %v1330_v18 = vadd.f32 %v2060_v17, %v2600_v25 }
 0x1df   : > { %v1324_v19 = vpop.f32.mrf.mxu1 }
 0x1e0   : > { %1532 = vst [vmem:[%s2603_s13 + $0xe8] sm:$0xff] %v1330_v18  ;;  %v1325_v21 = vadd.f32 %v2600_v25, %v1324_v19 }
 0x1e1   : > { %v2063_v22 = vpop.f32.mrf.mxu1 }
 0x1e2   : > { %1531 = vst [vmem:[%s2603_s13 + $0xe0] sm:$0xff] %v1325_v21  ;;  %v1340_v23 = vadd.f32 %v2063_v22, %v2600_v25 }
 0x1e3   : > { %v1334_v24 = vpop.f32.mrf.mxu1 }
 0x1e4   : > { %1534 = vst [vmem:[%s2603_s13 + $0xf8] sm:$0xff] %v1340_v23  ;;  %v1335_v20 = vadd.f32 %v2600_v25, %v1334_v24 }
 0x1e5   : > { %v2066_v26 = vpop.f32.mrf.mxu1 }
 0x1e6   : > { %1533 = vst [vmem:[%s2603_s13 + $0xf0] sm:$0xff] %v1335_v20  ;;  %v1350_v27 = vadd.f32 %v2066_v26, %v2600_v25 }
 0x1e7   : > { %v1344_v28 = vpop.f32.mrf.mxu1 }
 0x1e8   : > { %1536 = vst [vmem:[%s2603_s13 + $0x108] sm:$0xff] %v1350_v27  ;;  %v1345_v29 = vadd.f32 %v2600_v25, %v1344_v28 }
 0x1e9   : > { %v2069_v30 = vpop.f32.mrf.mxu1 }
 0x1ea   : > { %1535 = vst [vmem:[%s2603_s13 + $0x100] sm:$0xff] %v1345_v29  ;;  %v1360_v31 = vadd.f32 %v2069_v30, %v2600_v25 }
 0x1eb   : > { %v1354_v32 = vpop.f32.mrf.mxu1 }
 0x1ec   : > { %1538 = vst [vmem:[%s2603_s13 + $0x118] sm:$0xff] %v1360_v31  ;;  %v1355_v33 = vadd.f32 %v2600_v25, %v1354_v32 }
 0x1ed   : > { %v2072_v34 = vpop.f32.mrf.mxu1 }
 0x1ee   : > { %1537 = vst [vmem:[%s2603_s13 + $0x110] sm:$0xff] %v1355_v33  ;;  %v1370_v35 = vadd.f32 %v2072_v34, %v2600_v25 }
 0x1ef   : > { %v1364_v36 = vpop.f32.mrf.mxu1 }
 0x1f0   : > { %1540 = vst [vmem:[%s2603_s13 + $0x128] sm:$0xff] %v1370_v35  ;;  %v1365_v37 = vadd.f32 %v2600_v25, %v1364_v36 }
 0x1f1   : > { %v2075_v38 = vpop.f32.mrf.mxu1 }
 0x1f2   : > { %1539 = vst [vmem:[%s2603_s13 + $0x120] sm:$0xff] %v1365_v37  ;;  %v1380_v39 = vadd.f32 %v2075_v38, %v2600_v25 }
 0x1f3   : > { %v1374_v40 = vpop.f32.mrf.mxu1 }
 0x1f4   : > { %1542 = vst [vmem:[%s2603_s13 + $0x138] sm:$0xff] %v1380_v39  ;;  %v1375_v41 = vadd.f32 %v2600_v25, %v1374_v40 }
 0x1f5   : > { %v2078_v42 = vpop.f32.mrf.mxu1 }
 0x1f6   : > { %1541 = vst [vmem:[%s2603_s13 + $0x130] sm:$0xff] %v1375_v41  ;;  %v1390_v43 = vadd.f32 %v2078_v42, %v2600_v25 }
 0x1f7   : > { %v1384_v44 = vpop.f32.mrf.mxu1 }
 0x1f8   : > { %1544 = vst [vmem:[%s2603_s13 + $0x148] sm:$0xff] %v1390_v43  ;;  %v1385_v45 = vadd.f32 %v2600_v25, %v1384_v44 }
 0x1f9   : > { %v2081_v46 = vpop.f32.mrf.mxu1 }
 0x1fa   : > { %1543 = vst [vmem:[%s2603_s13 + $0x140] sm:$0xff] %v1385_v45  ;;  %v1400_v47 = vadd.f32 %v2081_v46, %v2600_v25 }
 0x1fb   : > { %v1394_v48 = vpop.f32.mrf.mxu1 }
 0x1fc   : > { %1546 = vst [vmem:[%s2603_s13 + $0x158] sm:$0xff] %v1400_v47  ;;  %v1395_v49 = vadd.f32 %v2600_v25, %v1394_v48 }
 0x1fd   : > { %v2084_v50 = vpop.f32.mrf.mxu1 }
 0x1fe   : > { %1545 = vst [vmem:[%s2603_s13 + $0x150] sm:$0xff] %v1395_v49  ;;  %v1410_v51 = vadd.f32 %v2084_v50, %v2600_v25 }
 0x1ff   : > { %v1404_v52 = vpop.f32.mrf.mxu1 }
 0x200   : > { %1548 = vst [vmem:[%s2603_s13 + $0x168] sm:$0xff] %v1410_v51  ;;  %v1405_v53 = vadd.f32 %v2600_v25, %v1404_v52 }
 0x201   : > { %v2087_v54 = vpop.f32.mrf.mxu1 }
 0x202   : > { %1547 = vst [vmem:[%s2603_s13 + $0x160] sm:$0xff] %v1405_v53  ;;  %v1420_v55 = vadd.f32 %v2087_v54, %v2600_v25 }
 0x203   : > { %v1414_v56 = vpop.f32.mrf.mxu1 }
 0x204   : > { %1550 = vst [vmem:[%s2603_s13 + $0x178] sm:$0xff] %v1420_v55  ;;  %v1415_v57 = vadd.f32 %v2600_v25, %v1414_v56 }
 0x205   : > { %v2090_v58 = vpop.f32.mrf.mxu1 }
 0x206   : > { %1549 = vst [vmem:[%s2603_s13 + $0x170] sm:$0xff] %v1415_v57  ;;  %v1430_v59 = vadd.f32 %v2090_v58, %v2600_v25 }
 0x207   : > { %v1424_v60 = vpop.f32.mrf.mxu1 }
 0x208   : > { %1552 = vst [vmem:[%s2603_s13 + $0x188] sm:$0xff] %v1430_v59  ;;  %v1425_v61 = vadd.f32 %v2600_v25, %v1424_v60 }
 0x209   : > { %v2093_v62 = vpop.f32.mrf.mxu1 }
 0x20a   : > { %1551 = vst [vmem:[%s2603_s13 + $0x180] sm:$0xff] %v1425_v61  ;;  %v1440_v63 = vadd.f32 %v2093_v62, %v2600_v25 }
 0x20b   : > { %v1434_v0 = vpop.f32.mrf.mxu1 }
 0x20c   : > { %1554 = vst [vmem:[%s2603_s13 + $0x198] sm:$0xff] %v1440_v63  ;;  %v1435_v1 = vadd.f32 %v2600_v25, %v1434_v0 }
 0x20d   : > { %v2096_v2 = vpop.f32.mrf.mxu1 }
 0x20e   : > { %1553 = vst [vmem:[%s2603_s13 + $0x190] sm:$0xff] %v1435_v1  ;;  %v1450_v3 = vadd.f32 %v2096_v2, %v2600_v25 }
 0x20f   : > { %v1444_v4 = vpop.f32.mrf.mxu1 }
 0x210   : > { %1556 = vst [vmem:[%s2603_s13 + $0x1a8] sm:$0xff] %v1450_v3  ;;  %v1445_v5 = vadd.f32 %v2600_v25, %v1444_v4 }
 0x211   : > { %v2099_v6 = vpop.f32.mrf.mxu1 }
 0x212   : > { %1555 = vst [vmem:[%s2603_s13 + $0x1a0] sm:$0xff] %v1445_v5  ;;  %v1460_v7 = vadd.f32 %v2099_v6, %v2600_v25 }
 0x213   : > { %v1454_v8 = vpop.f32.mrf.mxu1 }
 0x214   : > { %1558 = vst [vmem:[%s2603_s13 + $0x1b8] sm:$0xff] %v1460_v7  ;;  %v1455_v9 = vadd.f32 %v2600_v25, %v1454_v8 }
 0x215   : > { %v2102_v10 = vpop.f32.mrf.mxu1 }
 0x216   : > { %1557 = vst [vmem:[%s2603_s13 + $0x1b0] sm:$0xff] %v1455_v9  ;;  %v1470_v11 = vadd.f32 %v2102_v10, %v2600_v25 }
 0x217   : > { %v1464_v12 = vpop.f32.mrf.mxu1 }
 0x218   : > { %1560 = vst [vmem:[%s2603_s13 + $0x1c8] sm:$0xff] %v1470_v11  ;;  %v1465_v13 = vadd.f32 %v2600_v25, %v1464_v12 }
 0x219   : > { %v2105_v14 = vpop.f32.mrf.mxu1 }
 0x21a   : > { %1559 = vst [vmem:[%s2603_s13 + $0x1c0] sm:$0xff] %v1465_v13  ;;  %v1480_v15 = vadd.f32 %v2105_v14, %v2600_v25 }
 0x21b   : > { %v1474_v16 = vpop.f32.mrf.mxu1 }
 0x21c   : > { %1562 = vst [vmem:[%s2603_s13 + $0x1d8] sm:$0xff] %v1480_v15  ;;  %v1475_v17 = vadd.f32 %v2600_v25, %v1474_v16 }
 0x21d   : > { %v2108_v18 = vpop.f32.mrf.mxu1 }
 0x21e   : > { %1561 = vst [vmem:[%s2603_s13 + $0x1d0] sm:$0xff] %v1475_v17  ;;  %v1490_v19 = vadd.f32 %v2108_v18, %v2600_v25 }
 0x21f   : > { %v1484_v21 = vpop.f32.mrf.mxu1 }
 0x220   : > { %1564 = vst [vmem:[%s2603_s13 + $0x1e8] sm:$0xff] %v1490_v19  ;;  %v1485_v22 = vadd.f32 %v2600_v25, %v1484_v21 }
 0x221   : > { %v2111_v23 = vpop.f32.mrf.mxu1 }
 0x222   : > { %1563 = vst [vmem:[%s2603_s13 + $0x1e0] sm:$0xff] %v1485_v22  ;;  %v1500_v24 = vadd.f32 %v2111_v23, %v2600_v25  ;;  %1574 = sbr.rel (!%p2317_p5) target bundleno = 578 (0x242), region = 44 }
 0x223   : > { %v1494_v20 = vpop.f32.mrf.mxu1 }
 0x224   : > { %1566 = vst [vmem:[%s2603_s13 + $0x1f8] sm:$0xff] %v1500_v24  ;;  %v1495_v26 = vadd.f32 %v2600_v25, %v1494_v20 }
 0x226   : > { %1565 = vst [vmem:[%s2603_s13 + $0x1f0] sm:$0xff] %v1495_v26 }
 0x227   : > { %s2807_s15 = smov (!%p1577_p11, %s1576_s15), 64 }
 0x228   : > { %s2739_s16 = sshll.u32 %s2807_s15, 7 }
 0x229   : > { %s1581_s17 = ssub.s32 8192, %s2739_s16 }
 0x22a   : > { %1582 = vsyncadd %s2734_s14, %s1581_s17  ;;  %p1725_p12 = scmp.ne.s32.totalorder %s2739_s16, 0  ;;  %s1731_s23 = sshll.u32 %s2300_s22, 13 }
 0x22b   : > { %s2748_s30 = scalar_lea.hbm %s2799_s5, %s1731_s23  ;;  %s1587_s9 = sshll.u32 %s2603_s13, 4  ;;  %s2751_s9 = int_to_ptr.vmem [resolvable:$true] %s1587_s9 }
 0x22c   : > { %s2184_s6 = scalar_lea.vmem %s2751_s9, %s2739_s16  ;;  %s2246_s7 = smov [#allocation2]  }
 0x22d   : > { %p2185_p13 = scmp.ne.s32.totalorder %s2751_s9, %s2184_s6  ;;  %s2188_s8 = sshll.u32 %s2246_s7, 4  ;;  %s2189_s8 = int_to_ptr.vmem [resolvable:$false] %s2188_s8 }
 0x22e   : > { %s2190_s22 = scalar_lea.vmem %s2189_s8, 16384  ;;  %p2191_p2 = scmp.lt.s32.totalorder %s2751_s9, %s2189_s8 }
 0x22f   : > { %p2186_p0 = pnand %p2185_p13, %p1725_p12  ;;  %p2192_p3 = scmp.lt.s32.totalorder %s2190_s22, %s2184_s6 }
 0x231   : > { %p2187_p1 = pneg %p2186_p0  ;;  %p2193_p4 = por %p2192_p3, %p2191_p2 }
 0x233   : > { %p2194_p5 = pnand %p2193_p4, %p2187_p1 }
 0x235   : > { %2197 = shalt.err (!%p2194_p5)
}
 0x236   : > { %s2198_s26 = scalar_lea.hbm %s2748_s30, %s2739_s16  ;;  %s2202_s12 = scalar_lea.hbm %s2799_s5, 9600 }
 0x237   : > { %p2199_p7 = scmp.ne.s32.totalorder %s2748_s30, %s2198_s26  ;;  %p2203_p10 = scmp.lt.s32.totalorder %s2748_s30, %s2799_s5 }
 0x238   : > { %p2204_p11 = scmp.lt.s32.totalorder %s2202_s12, %s2198_s26 }
 0x239   : > { %p2200_p8 = pnand %p2199_p7, %p1725_p12 }
 0x23a   : > { %p2205_p13 = por %p2204_p11, %p2203_p10 }
 0x23b   : > { %p2201_p9 = pneg %p2200_p8 }
 0x23d   : > { %p2206_p0 = pnand %p2205_p13, %p2201_p9 }
 0x23f   : > { %2209 = shalt.err (!%p2206_p0)
}
 0x240   : > { %s2247_s17 = smov 128   ;;  %s2248_s23 = smov 8  }
 0x241   : > { %1593 = dma.vmem_to_hbm [thread:$0]  (%p1725_p12), %s2751_s9, %s2739_s16, %s2748_s30, %s2734_s14, %s2247_s17, %s2247_s17, %s2248_s23  }
 0x242 PF: > { %p2149_p1 = scmp.ge.s32.totalorder %s2244_s21, 2  ;;  %s1602_s25 = sand.u32 1, %s2232_s18  }
 0x243   : > { %s1603_s28 = scalar_lea.sflag [#allocation3], %s1602_s25 }
 0x244   : > { %p2146_p2 = pnand %p2149_p1, %p2321_p6 }
 0x246   : > { %p2147_p3 = pneg %p2146_p2 }
 0x248   : > { %2227 = dma.done.wait (%p2147_p3), %s1603_s28, 8192  }
 0x249   : > { %2229 = vsyncadd (%p2147_p3), %s1603_s28, 4294959104  ;;  %p15_p4 = scmp.ge.s32.totalorder %s2304_s24, 4   ;;  %s2802_s18 = smov %s2236_s19 }
 0x24a   : > { %s2803_s19 = smov %s2240_s20  ;;  %s2804_s20 = smov %s2315_s27 }
 0x24b   : > { %s2805_s21 = smov %s2304_s24  ;;  %17 = sbr.rel (!%p15_p4) target bundleno = 3 (0x3), region = 75 }
 0x250   :  { %1608 = vsyncpa [#allocation3], 1 }
 0x251   :  { %1610 = vsyncpa [#allocation3 + $0x1], 1 }

</bundles_post_ra>
